<compile_context>
chip_gen: v7x
topology: tpu7x:2x2x1
jax: 0.10.0
libtpu: 0.0.40
codegen_flags: <defaults>
</compile_context>

<pallas_src>
import jax
import jax.numpy as jnp
from jax import lax
from jax.experimental import pallas as pl
from jax.experimental.pallas import tpu as pltpu


# ----------------------------------------------------------------------------
# Pallas kernels
# ----------------------------------------------------------------------------
def _conv_bn_elu_kernel(wt_ref, cols_ref, b_ref, g_ref, beta_ref, o_ref):
    """Fused conv-as-GEMM + BatchNorm2d (training-mode batch stats) + ELU.

    Transposed, lane-dense layout:
      wt   : (Cout, K)   packed conv weight, K order = (kh, kw, cin), 8-padded
      cols : (K, R)      im2col patches, R = B*OH*OW on the lane axis
      b/g/beta : (Cout, 1)
      out  : (Cout, R)
    BN stats reduce over axis=-1 (lane axis -> XLU) at full VPU lane width.
    """
    y = jnp.dot(wt_ref[...], cols_ref[...], preferred_element_type=jnp.float32)
    y = y + b_ref[...]                                    # conv bias, lane-broadcast
    mean = jnp.mean(y, axis=1, keepdims=True)             # per-channel over (B,OH,OW)
    d = y - mean
    var = jnp.mean(d * d, axis=1, keepdims=True)          # biased var (BN training)
    t = g_ref[...] * (d * lax.rsqrt(var + 1e-5)) + beta_ref[...]
    # ELU(alpha=1). exp(min(t,0))-1 instead of expm1 (abs err ~1e-7; expm1 has
    # no guaranteed Mosaic lowering). Keep f32 throughout (v5e has no bf16 VPU).
    o_ref[...] = jnp.where(t > 0.0, t,
                           jnp.exp(jnp.minimum(t, 0.0)) - 1.0).astype(o_ref.dtype)


def _fc_tail_kernel(xf_ref, zf_ref, w11_ref, b11_ref, w12_ref, b12_ref,
                    w21x_ref, w21z_ref, b21_ref, w22_ref, b22_ref, o_ref):
    """Fused fc11(relu) -> fc12(relu) -> fc21(elu, concat folded) -> fc22(tanh).

    torch.cat((x, z2), 1) @ fc21_w.T is computed as x @ w21x + z2 @ w21z with
    fc21_w split column-wise at init, so the concat never materializes and all
    intermediates (<= B x 128 f32) stay in vregs/VMEM.
    """
    z1 = jnp.dot(zf_ref[...], w11_ref[...],
                 preferred_element_type=jnp.float32) + b11_ref[...]
    z1 = jnp.maximum(z1, 0.0)
    z2 = jnp.dot(z1, w12_ref[...],
                 preferred_element_type=jnp.float32) + b12_ref[...]
    z2 = jnp.maximum(z2, 0.0)
    h = (jnp.dot(xf_ref[...], w21x_ref[...], preferred_element_type=jnp.float32)
         + jnp.dot(z2, w21z_ref[...], preferred_element_type=jnp.float32)
         + b21_ref[...])
    h = jnp.where(h > 0.0, h, jnp.exp(jnp.minimum(h, 0.0)) - 1.0)      # ELU
    a = jnp.tanh(jnp.dot(h, w22_ref[...],
                         preferred_element_type=jnp.float32) + b22_ref[...])
    o_ref[...] = a.astype(o_ref.dtype)


def _spec2d(shape):
    return pl.BlockSpec(shape, lambda i: (0, 0))


def pallas_conv_bn_elu(cols_t, wt, b, g, beta):
    """cols_t: (K, R), wt: (Cout, K), b/g/beta: (Cout, 1) -> (Cout, R)."""
    Cout, K = wt.shape
    Kc, R = cols_t.shape
    assert Kc == K
    return pl.pallas_call(
        _conv_bn_elu_kernel,
        out_shape=jax.ShapeDtypeStruct((Cout, R), jnp.float32),
        grid=(1,),
        in_specs=[_spec2d((Cout, K)), _spec2d((K, R)),
                  _spec2d((Cout, 1)), _spec2d((Cout, 1)), _spec2d((Cout, 1))],
        out_specs=_spec2d((Cout, R)),
        compiler_params=pltpu.CompilerParams(dimension_semantics=("arbitrary",)),
    )(wt, cols_t, b, g, beta)


def pallas_fc_tail(xf, zf, pp):
    """xf: (B, n_conv_feat) NCHW-flatten order, zf: (B, M) -> (B, n_actions)."""
    B = xf.shape[0]
    n_actions = pp["fc22_wt"].shape[1]
    args = (xf, zf,
            pp["fc11_wt"], pp["fc11_b"], pp["fc12_wt"], pp["fc12_b"],
            pp["fc21_wxt"], pp["fc21_wzt"], pp["fc21_b"],
            pp["fc22_wt"], pp["fc22_b"])
    in_specs = [_spec2d(a.shape) for a in args]
    return pl.pallas_call(
        _fc_tail_kernel,
        out_shape=jax.ShapeDtypeStruct((B, n_actions), jnp.float32),
        grid=(1,),
        in_specs=in_specs,
        out_specs=_spec2d((B, n_actions)),
        compiler_params=pltpu.CompilerParams(dimension_semantics=("arbitrary",)),
    )(*args)


# ----------------------------------------------------------------------------
# Plain-JAX glue: transposed im2col (stack + reshape only, no transposes)
# ----------------------------------------------------------------------------
def im2col_t(x_cbhw, k=5, s=2, k_pad=None):
    """x: (C, B, H, W) -> cols (K, B*OH*OW) with K order (kh, kw, cin),
    optionally zero-padded up to k_pad rows (K multiple-of-8 alignment)."""
    C, B, H, W = x_cbhw.shape
    OH = (H - k) // s + 1
    OW = (W - k) // s + 1
    patches = []
    for kh in range(k):
        for kw in range(k):
            patches.append(x_cbhw[:, :, kh:kh + s * OH:s, kw:kw + s * OW:s])
    p = jnp.stack(patches, axis=0)                 # (k*k, C, B, OH, OW)
    cols = p.reshape(k * k * C, B * OH * OW)       # rows: (kh,kw,c); cols: (b,oh,ow)
    K = k * k * C
    if k_pad is not None and k_pad > K:
        cols = jnp.pad(cols, ((0, k_pad - K), (0, 0)))
    return cols, OH, OW


# ----------------------------------------------------------------------------
# One-time parameter packing (feedback: pre-transpose / pre-reshape at init)
# ----------------------------------------------------------------------------
def _round_up(n, m):
    return ((n + m - 1) // m) * m


def _pack_conv_w(w):
    """(Cout, Cin, KH, KW) -> (Cout, Kpad) with K order (kh, kw, cin)."""
    Cout, Cin, KH, KW = w.shape
    K = KH * KW * Cin
    wt = jnp.transpose(w, (0, 2, 3, 1)).reshape(Cout, K)
    Kp = _round_up(K, 8)
    if Kp > K:
        wt = jnp.pad(wt, ((0, 0), (0, Kp - K)))
    return wt


def pack_params(p):
    pp = {}
    for i in (1, 2, 3):
        pp[f"conv{i}_wt"] = _pack_conv_w(p[f"conv{i}_w"])
        pp[f"conv{i}_b"] = p[f"conv{i}_b"].reshape(-1, 1)
        pp[f"bn{i}_g"] = p[f"bn{i}_g"].reshape(-1, 1)
        pp[f"bn{i}_b"] = p[f"bn{i}_b"].reshape(-1, 1)
    pp["fc11_wt"] = p["fc11_w"].T
    pp["fc11_b"] = p["fc11_b"].reshape(1, -1)
    pp["fc12_wt"] = p["fc12_w"].T
    pp["fc12_b"] = p["fc12_b"].reshape(1, -1)
    n_xf = p["fc21_w"].shape[1] - p["fc12_w"].shape[0]   # conv-feature width (128)
    pp["fc21_wxt"] = p["fc21_w"][:, :n_xf].T             # (n_xf, 128)
    pp["fc21_wzt"] = p["fc21_w"][:, n_xf:].T             # (16, 128)
    pp["fc21_b"] = p["fc21_b"].reshape(1, -1)
    pp["fc22_wt"] = p["fc22_w"].T
    pp["fc22_b"] = p["fc22_b"].reshape(1, -1)
    return pp


# ----------------------------------------------------------------------------
# ActorNetwork forward (4 fused Pallas calls total)
# ----------------------------------------------------------------------------
def actor_forward(pp, x, z):
    B, _, H, W = x.shape
    # conv block 1: input NCHW with Cin=1 -> (C,B,H,W) is a free reshape
    c1, OH1, OW1 = im2col_t(x.reshape(1, B, H, W), k_pad=pp["conv1_wt"].shape[1])
    y1 = pallas_conv_bn_elu(c1, pp["conv1_wt"], pp["conv1_b"],
                            pp["bn1_g"], pp["bn1_b"])          # (16, B*OH1*OW1)
    # conv block 2
    c2, OH2, OW2 = im2col_t(y1.reshape(y1.shape[0], B, OH1, OW1),
                            k_pad=pp["conv2_wt"].shape[1])
    y2 = pallas_conv_bn_elu(c2, pp["conv2_wt"], pp["conv2_b"],
                            pp["bn2_g"], pp["bn2_b"])          # (32, B*OH2*OW2)
    # conv block 3
    c3, OH3, OW3 = im2col_t(y2.reshape(y2.shape[0], B, OH2, OW2),
                            k_pad=pp["conv3_wt"].shape[1])
    y3 = pallas_conv_bn_elu(c3, pp["conv3_wt"], pp["conv3_b"],
                            pp["bn3_g"], pp["bn3_b"])          # (32, B*OH3*OW3)
    # flatten(start_dim=1) in PyTorch NCHW order: (b, c*HW + h*W + w)
    C3 = y3.shape[0]
    xf = y3.reshape(C3, B, -1).transpose(1, 0, 2).reshape(B, -1)   # tiny (B,128)
    zf = z.reshape(B, -1)
    # fused FC tail (fc11 -> fc12 -> [concat folded] fc21 -> fc22)
    return pallas_fc_tail(xf, zf, pp)


# ----------------------------------------------------------------------------
# Pure-JAX reference (PyTorch semantics, HIGHEST-precision math)
# ----------------------------------------------------------------------------
def ref_forward(params, x, z):
    hp = lax.Precision.HIGHEST

    def elu(v):
        return jnp.where(v > 0.0, v, jnp.expm1(jnp.minimum(v, 0.0)))

    def conv(v, w, b):
        out = lax.conv_general_dilated(
            v, w, window_strides=(2, 2), padding="VALID",
            dimension_numbers=("NCHW", "OIHW", "NCHW"), precision=hp)
        return out + b.reshape(1, -1, 1, 1)

    def bn(v, g, be):
        mean = jnp.mean(v, axis=(0, 2, 3), keepdims=True)
        var = jnp.mean((v - mean) ** 2, axis=(0, 2, 3), keepdims=True)
        return g.reshape(1, -1, 1, 1) * (v - mean) * lax.rsqrt(var + 1e-5) \
            + be.reshape(1, -1, 1, 1)

    p = params
    x = elu(bn(conv(x, p["conv1_w"], p["conv1_b"]), p["bn1_g"], p["bn1_b"]))
    x = elu(bn(conv(x, p["conv2_w"], p["conv2_b"]), p["bn2_g"], p["bn2_b"]))
    x = elu(bn(conv(x, p["conv3_w"], p["conv3_b"]), p["bn3_g"], p["bn3_b"]))
    B = x.shape[0]
    xf = x.reshape(B, -1)
    zf = z.reshape(B, -1)
    z1 = jnp.maximum(jnp.dot(zf, p["fc11_w"].T, precision=hp) + p["fc11_b"], 0.0)
    z2 = jnp.maximum(jnp.dot(z1, p["fc12_w"].T, precision=hp) + p["fc12_b"], 0.0)
    h = elu(jnp.dot(jnp.concatenate([xf, z2], axis=1), p["fc21_w"].T,
                    precision=hp) + p["fc21_b"])
    return jnp.tanh(jnp.dot(h, p["fc22_w"].T, precision=hp) + p["fc22_b"])


# ----------------------------------------------------------------------------
# Deterministic parameter initialization (mirrors init_layer semantics)
# ----------------------------------------------------------------------------
def uniform(key, shape, sc):
    return jax.random.uniform(key, shape, jnp.float32, minval=-sc, maxval=sc)


def init_params(key, M, n_actions, linear_input_size):
    ks = jax.random.split(key, 14)
    p = {}
    p["conv1_w"] = uniform(ks[0], (16, 1, 5, 5), 1.0 / jnp.sqrt(16.0))
    p["conv1_b"] = uniform(ks[1], (16,), 1.0 / jnp.sqrt(16.0))
    p["conv2_w"] = uniform(ks[2], (32, 16, 5, 5), 1.0 / jnp.sqrt(32.0))
    p["conv2_b"] = uniform(ks[3], (32,), 1.0 / jnp.sqrt(32.0))
    p["conv3_w"] = uniform(ks[4], (32, 32, 5, 5), 1.0 / jnp.sqrt(32.0))
    p["conv3_b"] = uniform(ks[5], (32,), 1.0 / jnp.sqrt(32.0))
    p["bn1_g"], p["bn1_b"] = jnp.ones((16,)), jnp.zeros((16,))
    p["bn2_g"], p["bn2_b"] = jnp.ones((32,)), jnp.zeros((32,))
    p["bn3_g"], p["bn3_b"] = jnp.ones((32,)), jnp.zeros((32,))
    p["fc11_w"] = uniform(ks[6], (128, M), 1.0 / jnp.sqrt(128.0))
    p["fc11_b"] = uniform(ks[7], (128,), 1.0 / jnp.sqrt(128.0))
    p["fc12_w"] = uniform(ks[8], (16, 128), 1.0 / jnp.sqrt(16.0))
    p["fc12_b"] = uniform(ks[9], (16,), 1.0 / jnp.sqrt(16.0))
    p["fc21_w"] = uniform(ks[10], (128, linear_input_size), 1.0 / jnp.sqrt(128.0))
    p["fc21_b"] = uniform(ks[11], (128,), 1.0 / jnp.sqrt(128.0))
    p["fc22_w"] = uniform(ks[12], (n_actions, 128), 0.003)
    p["fc22_b"] = uniform(ks[13], (n_actions,), 0.003)
    return p


if __name__ == "__main__":
    # Shapes consistent with the module: input_dims = (1, 37, 37), M = 8,
    # n_actions = 4, batch = 2.
    B, H, W = 2, 37, 37
    M_feat, n_actions = 8, 4

    def conv2d_size_out(size, kernel_size=5, stride=2):
        return (size - (kernel_size - 1) - 1) // stride + 1

    convw = conv2d_size_out(conv2d_size_out(conv2d_size_out(W)))
    convh = conv2d_size_out(conv2d_size_out(conv2d_size_out(H)))
    linear_input_size = convw * convh * 32 + 16   # 2*2*32 + 16 = 144

    root = jax.random.PRNGKey(0)
    k_param, k_x, k_z = jax.random.split(root, 3)
    params = init_params(k_param, M_feat, n_actions, linear_input_size)
    packed = pack_params(params)      # one-time weight repack/transpose/pad

    x = jax.random.normal(k_x, (B, 1, H, W), jnp.float32)   # NCHW, like PyTorch
    z = jax.random.normal(k_z, (B, M_feat), jnp.float32)

    fwd = jax.jit(actor_forward)
    actions = jax.block_until_ready(fwd(packed, x, z))

    ref = jax.block_until_ready(jax.jit(ref_forward)(params, x, z))
    assert actions.shape == (B, n_actions)
    # tightened from 5e-2; 2e-3 leaves margin for MXU f32 pass differences
    assert jnp.max(jnp.abs(actions - ref)) < 2e-3, "mismatch vs reference"

    print("KERNEL_OK")
</pallas_src>

<mosaic_0001>
module attributes {stable_mosaic.version = 11 : i64} {
  func.func @_conv_bn_elu_kernel(%arg0: i32, %arg1: memref<16x32xf32, #tpu.memory_space<vmem>>, %arg2: memref<32x578xf32, #tpu.memory_space<vmem>>, %arg3: memref<16x1xf32, #tpu.memory_space<vmem>>, %arg4: memref<16x1xf32, #tpu.memory_space<vmem>>, %arg5: memref<16x1xf32, #tpu.memory_space<vmem>>, %arg6: memref<16x578xf32, #tpu.memory_space<vmem>>) attributes {dimension_semantics = [#tpu.dimension_semantics<arbitrary>], iteration_bounds = array<i64: 1>, scalar_prefetch = 0 : i64, scratch_operands = 0 : i64, tpu.core_type = #tpu.core_type<tc>, window_params = [{pipeline_mode = #tpu.pipeline_mode<synchronous>, transform_indices = @transform_0, window_bounds = array<i64: 16, 32>}, {pipeline_mode = #tpu.pipeline_mode<synchronous>, transform_indices = @transform_1, window_bounds = array<i64: 32, 578>}, {pipeline_mode = #tpu.pipeline_mode<synchronous>, transform_indices = @transform_2, window_bounds = array<i64: 16, 1>}, {pipeline_mode = #tpu.pipeline_mode<synchronous>, transform_indices = @transform_3, window_bounds = array<i64: 16, 1>}, {pipeline_mode = #tpu.pipeline_mode<synchronous>, transform_indices = @transform_4, window_bounds = array<i64: 16, 1>}, {pipeline_mode = #tpu.pipeline_mode<synchronous>, transform_indices = @transform_5, window_bounds = array<i64: 16, 578>}]} {
    %c0 = arith.constant 0 : index
    %c0_0 = arith.constant 0 : index
    %0 = vector.load %arg1[%c0, %c0_0] : memref<16x32xf32, #tpu.memory_space<vmem>>, vector<16x32xf32>
    %c0_1 = arith.constant 0 : index
    %c0_2 = arith.constant 0 : index
    %1 = vector.load %arg2[%c0_1, %c0_2] : memref<32x578xf32, #tpu.memory_space<vmem>>, vector<32x578xf32>
    %cst = arith.constant dense<0.000000e+00> : vector<16x578xf32>
    %2 = tpu.matmul %0, %1, %cst {dimension_numbers = #tpu.dot_dimension_numbers<[1], [0], [0], [1], [0, 0, 1, 1], [], []>} : vector<16x32xf32>, vector<32x578xf32>, vector<16x578xf32> -> vector<16x578xf32>
    %c0_3 = arith.constant 0 : index
    %c0_4 = arith.constant 0 : index
    %3 = vector.load %arg3[%c0_3, %c0_4] : memref<16x1xf32, #tpu.memory_space<vmem>>, vector<16x1xf32>
    %4 = vector.broadcast %3 : vector<16x1xf32> to vector<16x578xf32>
    %5 = arith.addf %2, %4 : vector<16x578xf32>
    %cst_5 = arith.constant dense<0.000000e+00> : vector<16xf32>
    %6 = vector.multi_reduction <add>, %5, %cst_5 [1] : vector<16x578xf32> to vector<16xf32>
    %7 = vector.shape_cast %6 : vector<16xf32> to vector<16x1xf32>
    %cst_6 = arith.constant 5.780000e+02 : f32
    %8 = vector.broadcast %cst_6 : f32 to vector<16x1xf32>
    %9 = arith.divf %7, %8 : vector<16x1xf32>
    %10 = vector.broadcast %9 : vector<16x1xf32> to vector<16x578xf32>
    %11 = arith.subf %5, %10 : vector<16x578xf32>
    %12 = arith.mulf %11, %11 : vector<16x578xf32>
    %cst_7 = arith.constant dense<0.000000e+00> : vector<16xf32>
    %13 = vector.multi_reduction <add>, %12, %cst_7 [1] : vector<16x578xf32> to vector<16xf32>
    %14 = vector.shape_cast %13 : vector<16xf32> to vector<16x1xf32>
    %cst_8 = arith.constant 5.780000e+02 : f32
    %15 = vector.broadcast %cst_8 : f32 to vector<16x1xf32>
    %16 = arith.divf %14, %15 : vector<16x1xf32>
    %c0_9 = arith.constant 0 : index
    %c0_10 = arith.constant 0 : index
    %17 = vector.load %arg4[%c0_9, %c0_10] : memref<16x1xf32, #tpu.memory_space<vmem>>, vector<16x1xf32>
    %cst_11 = arith.constant 9.99999974E-6 : f32
    %18 = vector.broadcast %cst_11 : f32 to vector<16x1xf32>
    %19 = arith.addf %16, %18 : vector<16x1xf32>
    %20 = math.rsqrt %19 : vector<16x1xf32>
    %21 = vector.broadcast %20 : vector<16x1xf32> to vector<16x578xf32>
    %22 = arith.mulf %11, %21 : vector<16x578xf32>
    %23 = vector.broadcast %17 : vector<16x1xf32> to vector<16x578xf32>
    %24 = arith.mulf %23, %22 : vector<16x578xf32>
    %c0_12 = arith.constant 0 : index
    %c0_13 = arith.constant 0 : index
    %25 = vector.load %arg5[%c0_12, %c0_13] : memref<16x1xf32, #tpu.memory_space<vmem>>, vector<16x1xf32>
    %26 = vector.broadcast %25 : vector<16x1xf32> to vector<16x578xf32>
    %27 = arith.addf %24, %26 : vector<16x578xf32>
    %cst_14 = arith.constant 0.000000e+00 : f32
    %28 = vector.broadcast %cst_14 : f32 to vector<16x578xf32>
    %29 = arith.cmpf ogt, %27, %28 : vector<16x578xf32>
    %cst_15 = arith.constant 0.000000e+00 : f32
    %30 = vector.broadcast %cst_15 : f32 to vector<16x578xf32>
    %31 = arith.minimumf %27, %30 : vector<16x578xf32>
    %32 = math.exp %31 : vector<16x578xf32>
    %cst_16 = arith.constant 1.000000e+00 : f32
    %33 = vector.broadcast %cst_16 : f32 to vector<16x578xf32>
    %34 = arith.subf %32, %33 : vector<16x578xf32>
    %35 = arith.select %29, %27, %34 : vector<16x578xi1>, vector<16x578xf32>
    %c0_17 = arith.constant 0 : index
    %c0_18 = arith.constant 0 : index
    %36 = vector.load %arg6[%c0_17, %c0_18] : memref<16x578xf32, #tpu.memory_space<vmem>>, vector<16x578xf32>
    tpu.vector_store %arg6[%c0_17, %c0_18], %35 {strides = array<i32>} : memref<16x578xf32, #tpu.memory_space<vmem>>, vector<16x578xf32>,
    return
  }
  func.func @transform_0(%arg0: i32) -> (i32, i32) {
    %c0_i32 = arith.constant 0 : i32
    %c0_i32_0 = arith.constant 0 : i32
    %c0_i32_1 = arith.constant 0 : i32
    return %c0_i32, %c0_i32_0 : i32, i32
  }
  func.func @transform_1(%arg0: i32) -> (i32, i32) {
    %c0_i32 = arith.constant 0 : i32
    %c0_i32_0 = arith.constant 0 : i32
    %c0_i32_1 = arith.constant 0 : i32
    return %c0_i32, %c0_i32_0 : i32, i32
  }
  func.func @transform_2(%arg0: i32) -> (i32, i32) {
    %c0_i32 = arith.constant 0 : i32
    %c0_i32_0 = arith.constant 0 : i32
    %c0_i32_1 = arith.constant 0 : i32
    return %c0_i32, %c0_i32_0 : i32, i32
  }
  func.func @transform_3(%arg0: i32) -> (i32, i32) {
    %c0_i32 = arith.constant 0 : i32
    %c0_i32_0 = arith.constant 0 : i32
    %c0_i32_1 = arith.constant 0 : i32
    return %c0_i32, %c0_i32_0 : i32, i32
  }
  func.func @transform_4(%arg0: i32) -> (i32, i32) {
    %c0_i32 = arith.constant 0 : i32
    %c0_i32_0 = arith.constant 0 : i32
    %c0_i32_1 = arith.constant 0 : i32
    return %c0_i32, %c0_i32_0 : i32, i32
  }
  func.func @transform_5(%arg0: i32) -> (i32, i32) {
    %c0_i32 = arith.constant 0 : i32
    %c0_i32_0 = arith.constant 0 : i32
    %c0_i32_1 = arith.constant 0 : i32
    return %c0_i32, %c0_i32_0 : i32, i32
  }
}

module attributes {stable_mosaic.version = 11 : i64} {
  func.func @_conv_bn_elu_kernel(%arg0: i32, %arg1: memref<32x400xf32, #tpu.memory_space<vmem>>, %arg2: memref<400x98xf32, #tpu.memory_space<vmem>>, %arg3: memref<32x1xf32, #tpu.memory_space<vmem>>, %arg4: memref<32x1xf32, #tpu.memory_space<vmem>>, %arg5: memref<32x1xf32, #tpu.memory_space<vmem>>, %arg6: memref<32x98xf32, #tpu.memory_space<vmem>>) attributes {dimension_semantics = [#tpu.dimension_semantics<arbitrary>], iteration_bounds = array<i64: 1>, scalar_prefetch = 0 : i64, scratch_operands = 0 : i64, tpu.core_type = #tpu.core_type<tc>, window_params = [{pipeline_mode = #tpu.pipeline_mode<synchronous>, transform_indices = @transform_0, window_bounds = array<i64: 32, 400>}, {pipeline_mode = #tpu.pipeline_mode<synchronous>, transform_indices = @transform_1, window_bounds = array<i64: 400, 98>}, {pipeline_mode = #tpu.pipeline_mode<synchronous>, transform_indices = @transform_2, window_bounds = array<i64: 32, 1>}, {pipeline_mode = #tpu.pipeline_mode<synchronous>, transform_indices = @transform_3, window_bounds = array<i64: 32, 1>}, {pipeline_mode = #tpu.pipeline_mode<synchronous>, transform_indices = @transform_4, window_bounds = array<i64: 32, 1>}, {pipeline_mode = #tpu.pipeline_mode<synchronous>, transform_indices = @transform_5, window_bounds = array<i64: 32, 98>}]} {
    %c0 = arith.constant 0 : index
    %c0_0 = arith.constant 0 : index
    %0 = vector.load %arg1[%c0, %c0_0] : memref<32x400xf32, #tpu.memory_space<vmem>>, vector<32x400xf32>
    %c0_1 = arith.constant 0 : index
    %c0_2 = arith.constant 0 : index
    %1 = vector.load %arg2[%c0_1, %c0_2] : memref<400x98xf32, #tpu.memory_space<vmem>>, vector<400x98xf32>
    %cst = arith.constant dense<0.000000e+00> : vector<32x98xf32>
    %2 = tpu.matmul %0, %1, %cst {dimension_numbers = #tpu.dot_dimension_numbers<[1], [0], [0], [1], [0, 0, 1, 1], [], []>} : vector<32x400xf32>, vector<400x98xf32>, vector<32x98xf32> -> vector<32x98xf32>
    %c0_3 = arith.constant 0 : index
    %c0_4 = arith.constant 0 : index
    %3 = vector.load %arg3[%c0_3, %c0_4] : memref<32x1xf32, #tpu.memory_space<vmem>>, vector<32x1xf32>
    %4 = vector.broadcast %3 : vector<32x1xf32> to vector<32x98xf32>
    %5 = arith.addf %2, %4 : vector<32x98xf32>
    %cst_5 = arith.constant dense<0.000000e+00> : vector<32xf32>
    %6 = vector.multi_reduction <add>, %5, %cst_5 [1] : vector<32x98xf32> to vector<32xf32>
    %7 = vector.shape_cast %6 : vector<32xf32> to vector<32x1xf32>
    %cst_6 = arith.constant 9.800000e+01 : f32
    %8 = vector.broadcast %cst_6 : f32 to vector<32x1xf32>
    %9 = arith.divf %7, %8 : vector<32x1xf32>
    %10 = vector.broadcast %9 : vector<32x1xf32> to vector<32x98xf32>
    %11 = arith.subf %5, %10 : vector<32x98xf32>
    %12 = arith.mulf %11, %11 : vector<32x98xf32>
    %cst_7 = arith.constant dense<0.000000e+00> : vector<32xf32>
    %13 = vector.multi_reduction <add>, %12, %cst_7 [1] : vector<32x98xf32> to vector<32xf32>
    %14 = vector.shape_cast %13 : vector<32xf32> to vector<32x1xf32>
    %cst_8 = arith.constant 9.800000e+01 : f32
    %15 = vector.broadcast %cst_8 : f32 to vector<32x1xf32>
    %16 = arith.divf %14, %15 : vector<32x1xf32>
    %c0_9 = arith.constant 0 : index
    %c0_10 = arith.constant 0 : index
    %17 = vector.load %arg4[%c0_9, %c0_10] : memref<32x1xf32, #tpu.memory_space<vmem>>, vector<32x1xf32>
    %cst_11 = arith.constant 9.99999974E-6 : f32
    %18 = vector.broadcast %cst_11 : f32 to vector<32x1xf32>
    %19 = arith.addf %16, %18 : vector<32x1xf32>
    %20 = math.rsqrt %19 : vector<32x1xf32>
    %21 = vector.broadcast %20 : vector<32x1xf32> to vector<32x98xf32>
    %22 = arith.mulf %11, %21 : vector<32x98xf32>
    %23 = vector.broadcast %17 : vector<32x1xf32> to vector<32x98xf32>
    %24 = arith.mulf %23, %22 : vector<32x98xf32>
    %c0_12 = arith.constant 0 : index
    %c0_13 = arith.constant 0 : index
    %25 = vector.load %arg5[%c0_12, %c0_13] : memref<32x1xf32, #tpu.memory_space<vmem>>, vector<32x1xf32>
    %26 = vector.broadcast %25 : vector<32x1xf32> to vector<32x98xf32>
    %27 = arith.addf %24, %26 : vector<32x98xf32>
    %cst_14 = arith.constant 0.000000e+00 : f32
    %28 = vector.broadcast %cst_14 : f32 to vector<32x98xf32>
    %29 = arith.cmpf ogt, %27, %28 : vector<32x98xf32>
    %cst_15 = arith.constant 0.000000e+00 : f32
    %30 = vector.broadcast %cst_15 : f32 to vector<32x98xf32>
    %31 = arith.minimumf %27, %30 : vector<32x98xf32>
    %32 = math.exp %31 : vector<32x98xf32>
    %cst_16 = arith.constant 1.000000e+00 : f32
    %33 = vector.broadcast %cst_16 : f32 to vector<32x98xf32>
    %34 = arith.subf %32, %33 : vector<32x98xf32>
    %35 = arith.select %29, %27, %34 : vector<32x98xi1>, vector<32x98xf32>
    %c0_17 = arith.constant 0 : index
    %c0_18 = arith.constant 0 : index
    %36 = vector.load %arg6[%c0_17, %c0_18] : memref<32x98xf32, #tpu.memory_space<vmem>>, vector<32x98xf32>
    tpu.vector_store %arg6[%c0_17, %c0_18], %35 {strides = array<i32>} : memref<32x98xf32, #tpu.memory_space<vmem>>, vector<32x98xf32>,
    return
  }
  func.func @transform_0(%arg0: i32) -> (i32, i32) {
    %c0_i32 = arith.constant 0 : i32
    %c0_i32_0 = arith.constant 0 : i32
    %c0_i32_1 = arith.constant 0 : i32
    return %c0_i32, %c0_i32_0 : i32, i32
  }
  func.func @transform_1(%arg0: i32) -> (i32, i32) {
    %c0_i32 = arith.constant 0 : i32
    %c0_i32_0 = arith.constant 0 : i32
    %c0_i32_1 = arith.constant 0 : i32
    return %c0_i32, %c0_i32_0 : i32, i32
  }
  func.func @transform_2(%arg0: i32) -> (i32, i32) {
    %c0_i32 = arith.constant 0 : i32
    %c0_i32_0 = arith.constant 0 : i32
    %c0_i32_1 = arith.constant 0 : i32
    return %c0_i32, %c0_i32_0 : i32, i32
  }
  func.func @transform_3(%arg0: i32) -> (i32, i32) {
    %c0_i32 = arith.constant 0 : i32
    %c0_i32_0 = arith.constant 0 : i32
    %c0_i32_1 = arith.constant 0 : i32
    return %c0_i32, %c0_i32_0 : i32, i32
  }
  func.func @transform_4(%arg0: i32) -> (i32, i32) {
    %c0_i32 = arith.constant 0 : i32
    %c0_i32_0 = arith.constant 0 : i32
    %c0_i32_1 = arith.constant 0 : i32
    return %c0_i32, %c0_i32_0 : i32, i32
  }
  func.func @transform_5(%arg0: i32) -> (i32, i32) {
    %c0_i32 = arith.constant 0 : i32
    %c0_i32_0 = arith.constant 0 : i32
    %c0_i32_1 = arith.constant 0 : i32
    return %c0_i32, %c0_i32_0 : i32, i32
  }
}

module attributes {stable_mosaic.version = 11 : i64} {
  func.func @_conv_bn_elu_kernel(%arg0: i32, %arg1: memref<32x800xf32, #tpu.memory_space<vmem>>, %arg2: memref<800x8xf32, #tpu.memory_space<vmem>>, %arg3: memref<32x1xf32, #tpu.memory_space<vmem>>, %arg4: memref<32x1xf32, #tpu.memory_space<vmem>>, %arg5: memref<32x1xf32, #tpu.memory_space<vmem>>, %arg6: memref<32x8xf32, #tpu.memory_space<vmem>>) attributes {dimension_semantics = [#tpu.dimension_semantics<arbitrary>], iteration_bounds = array<i64: 1>, scalar_prefetch = 0 : i64, scratch_operands = 0 : i64, tpu.core_type = #tpu.core_type<tc>, window_params = [{pipeline_mode = #tpu.pipeline_mode<synchronous>, transform_indices = @transform_0, window_bounds = array<i64: 32, 800>}, {pipeline_mode = #tpu.pipeline_mode<synchronous>, transform_indices = @transform_1, window_bounds = array<i64: 800, 8>}, {pipeline_mode = #tpu.pipeline_mode<synchronous>, transform_indices = @transform_2, window_bounds = array<i64: 32, 1>}, {pipeline_mode = #tpu.pipeline_mode<synchronous>, transform_indices = @transform_3, window_bounds = array<i64: 32, 1>}, {pipeline_mode = #tpu.pipeline_mode<synchronous>, transform_indices = @transform_4, window_bounds = array<i64: 32, 1>}, {pipeline_mode = #tpu.pipeline_mode<synchronous>, transform_indices = @transform_5, window_bounds = array<i64: 32, 8>}]} {
    %c0 = arith.constant 0 : index
    %c0_0 = arith.constant 0 : index
    %0 = vector.load %arg1[%c0, %c0_0] : memref<32x800xf32, #tpu.memory_space<vmem>>, vector<32x800xf32>
    %c0_1 = arith.constant 0 : index
    %c0_2 = arith.constant 0 : index
    %1 = vector.load %arg2[%c0_1, %c0_2] : memref<800x8xf32, #tpu.memory_space<vmem>>, vector<800x8xf32>
    %cst = arith.constant dense<0.000000e+00> : vector<32x8xf32>
    %2 = tpu.matmul %0, %1, %cst {dimension_numbers = #tpu.dot_dimension_numbers<[1], [0], [0], [1], [0, 0, 1, 1], [], []>} : vector<32x800xf32>, vector<800x8xf32>, vector<32x8xf32> -> vector<32x8xf32>
    %c0_3 = arith.constant 0 : index
    %c0_4 = arith.constant 0 : index
    %3 = vector.load %arg3[%c0_3, %c0_4] : memref<32x1xf32, #tpu.memory_space<vmem>>, vector<32x1xf32>
    %4 = vector.broadcast %3 : vector<32x1xf32> to vector<32x8xf32>
    %5 = arith.addf %2, %4 : vector<32x8xf32>
    %cst_5 = arith.constant dense<0.000000e+00> : vector<32xf32>
    %6 = vector.multi_reduction <add>, %5, %cst_5 [1] : vector<32x8xf32> to vector<32xf32>
    %7 = vector.shape_cast %6 : vector<32xf32> to vector<32x1xf32>
    %cst_6 = arith.constant 8.000000e+00 : f32
    %8 = vector.broadcast %cst_6 : f32 to vector<32x1xf32>
    %9 = arith.divf %7, %8 : vector<32x1xf32>
    %10 = vector.broadcast %9 : vector<32x1xf32> to vector<32x8xf32>
    %11 = arith.subf %5, %10 : vector<32x8xf32>
    %12 = arith.mulf %11, %11 : vector<32x8xf32>
    %cst_7 = arith.constant dense<0.000000e+00> : vector<32xf32>
    %13 = vector.multi_reduction <add>, %12, %cst_7 [1] : vector<32x8xf32> to vector<32xf32>
    %14 = vector.shape_cast %13 : vector<32xf32> to vector<32x1xf32>
    %cst_8 = arith.constant 8.000000e+00 : f32
    %15 = vector.broadcast %cst_8 : f32 to vector<32x1xf32>
    %16 = arith.divf %14, %15 : vector<32x1xf32>
    %c0_9 = arith.constant 0 : index
    %c0_10 = arith.constant 0 : index
    %17 = vector.load %arg4[%c0_9, %c0_10] : memref<32x1xf32, #tpu.memory_space<vmem>>, vector<32x1xf32>
    %cst_11 = arith.constant 9.99999974E-6 : f32
    %18 = vector.broadcast %cst_11 : f32 to vector<32x1xf32>
    %19 = arith.addf %16, %18 : vector<32x1xf32>
    %20 = math.rsqrt %19 : vector<32x1xf32>
    %21 = vector.broadcast %20 : vector<32x1xf32> to vector<32x8xf32>
    %22 = arith.mulf %11, %21 : vector<32x8xf32>
    %23 = vector.broadcast %17 : vector<32x1xf32> to vector<32x8xf32>
    %24 = arith.mulf %23, %22 : vector<32x8xf32>
    %c0_12 = arith.constant 0 : index
    %c0_13 = arith.constant 0 : index
    %25 = vector.load %arg5[%c0_12, %c0_13] : memref<32x1xf32, #tpu.memory_space<vmem>>, vector<32x1xf32>
    %26 = vector.broadcast %25 : vector<32x1xf32> to vector<32x8xf32>
    %27 = arith.addf %24, %26 : vector<32x8xf32>
    %cst_14 = arith.constant 0.000000e+00 : f32
    %28 = vector.broadcast %cst_14 : f32 to vector<32x8xf32>
    %29 = arith.cmpf ogt, %27, %28 : vector<32x8xf32>
    %cst_15 = arith.constant 0.000000e+00 : f32
    %30 = vector.broadcast %cst_15 : f32 to vector<32x8xf32>
    %31 = arith.minimumf %27, %30 : vector<32x8xf32>
    %32 = math.exp %31 : vector<32x8xf32>
    %cst_16 = arith.constant 1.000000e+00 : f32
    %33 = vector.broadcast %cst_16 : f32 to vector<32x8xf32>
    %34 = arith.subf %32, %33 : vector<32x8xf32>
    %35 = arith.select %29, %27, %34 : vector<32x8xi1>, vector<32x8xf32>
    %c0_17 = arith.constant 0 : index
    %c0_18 = arith.constant 0 : index
    %36 = vector.load %arg6[%c0_17, %c0_18] : memref<32x8xf32, #tpu.memory_space<vmem>>, vector<32x8xf32>
    tpu.vector_store %arg6[%c0_17, %c0_18], %35 {strides = array<i32>} : memref<32x8xf32, #tpu.memory_space<vmem>>, vector<32x8xf32>,
    return
  }
  func.func @transform_0(%arg0: i32) -> (i32, i32) {
    %c0_i32 = arith.constant 0 : i32
    %c0_i32_0 = arith.constant 0 : i32
    %c0_i32_1 = arith.constant 0 : i32
    return %c0_i32, %c0_i32_0 : i32, i32
  }
  func.func @transform_1(%arg0: i32) -> (i32, i32) {
    %c0_i32 = arith.constant 0 : i32
    %c0_i32_0 = arith.constant 0 : i32
    %c0_i32_1 = arith.constant 0 : i32
    return %c0_i32, %c0_i32_0 : i32, i32
  }
  func.func @transform_2(%arg0: i32) -> (i32, i32) {
    %c0_i32 = arith.constant 0 : i32
    %c0_i32_0 = arith.constant 0 : i32
    %c0_i32_1 = arith.constant 0 : i32
    return %c0_i32, %c0_i32_0 : i32, i32
  }
  func.func @transform_3(%arg0: i32) -> (i32, i32) {
    %c0_i32 = arith.constant 0 : i32
    %c0_i32_0 = arith.constant 0 : i32
    %c0_i32_1 = arith.constant 0 : i32
    return %c0_i32, %c0_i32_0 : i32, i32
  }
  func.func @transform_4(%arg0: i32) -> (i32, i32) {
    %c0_i32 = arith.constant 0 : i32
    %c0_i32_0 = arith.constant 0 : i32
    %c0_i32_1 = arith.constant 0 : i32
    return %c0_i32, %c0_i32_0 : i32, i32
  }
  func.func @transform_5(%arg0: i32) -> (i32, i32) {
    %c0_i32 = arith.constant 0 : i32
    %c0_i32_0 = arith.constant 0 : i32
    %c0_i32_1 = arith.constant 0 : i32
    return %c0_i32, %c0_i32_0 : i32, i32
  }
}

module attributes {stable_mosaic.version = 11 : i64} {
  func.func @_fc_tail_kernel(%arg0: i32, %arg1: memref<2x128xf32, #tpu.memory_space<vmem>>, %arg2: memref<2x8xf32, #tpu.memory_space<vmem>>, %arg3: memref<8x128xf32, #tpu.memory_space<vmem>>, %arg4: memref<1x128xf32, #tpu.memory_space<vmem>>, %arg5: memref<128x16xf32, #tpu.memory_space<vmem>>, %arg6: memref<1x16xf32, #tpu.memory_space<vmem>>, %arg7: memref<128x128xf32, #tpu.memory_space<vmem>>, %arg8: memref<16x128xf32, #tpu.memory_space<vmem>>, %arg9: memref<1x128xf32, #tpu.memory_space<vmem>>, %arg10: memref<128x4xf32, #tpu.memory_space<vmem>>, %arg11: memref<1x4xf32, #tpu.memory_space<vmem>>, %arg12: memref<2x4xf32, #tpu.memory_space<vmem>>) attributes {dimension_semantics = [#tpu.dimension_semantics<arbitrary>], iteration_bounds = array<i64: 1>, scalar_prefetch = 0 : i64, scratch_operands = 0 : i64, tpu.core_type = #tpu.core_type<tc>, window_params = [{pipeline_mode = #tpu.pipeline_mode<synchronous>, transform_indices = @transform_0, window_bounds = array<i64: 2, 128>}, {pipeline_mode = #tpu.pipeline_mode<synchronous>, transform_indices = @transform_1, window_bounds = array<i64: 2, 8>}, {pipeline_mode = #tpu.pipeline_mode<synchronous>, transform_indices = @transform_2, window_bounds = array<i64: 8, 128>}, {pipeline_mode = #tpu.pipeline_mode<synchronous>, transform_indices = @transform_3, window_bounds = array<i64: 1, 128>}, {pipeline_mode = #tpu.pipeline_mode<synchronous>, transform_indices = @transform_4, window_bounds = array<i64: 128, 16>}, {pipeline_mode = #tpu.pipeline_mode<synchronous>, transform_indices = @transform_5, window_bounds = array<i64: 1, 16>}, {pipeline_mode = #tpu.pipeline_mode<synchronous>, transform_indices = @transform_6, window_bounds = array<i64: 128, 128>}, {pipeline_mode = #tpu.pipeline_mode<synchronous>, transform_indices = @transform_7, window_bounds = array<i64: 16, 128>}, {pipeline_mode = #tpu.pipeline_mode<synchronous>, transform_indices = @transform_8, window_bounds = array<i64: 1, 128>}, {pipeline_mode = #tpu.pipeline_mode<synchronous>, transform_indices = @transform_9, window_bounds = array<i64: 128, 4>}, {pipeline_mode = #tpu.pipeline_mode<synchronous>, transform_indices = @transform_10, window_bounds = array<i64: 1, 4>}, {pipeline_mode = #tpu.pipeline_mode<synchronous>, transform_indices = @transform_11, window_bounds = array<i64: 2, 4>}]} {
    %c0 = arith.constant 0 : index
    %c0_0 = arith.constant 0 : index
    %0 = vector.load %arg2[%c0, %c0_0] : memref<2x8xf32, #tpu.memory_space<vmem>>, vector<2x8xf32>
    %c0_1 = arith.constant 0 : index
    %c0_2 = arith.constant 0 : index
    %1 = vector.load %arg3[%c0_1, %c0_2] : memref<8x128xf32, #tpu.memory_space<vmem>>, vector<8x128xf32>
    %cst = arith.constant dense<0.000000e+00> : vector<2x128xf32>
    %2 = tpu.matmul %0, %1, %cst {dimension_numbers = #tpu.dot_dimension_numbers<[1], [0], [0], [1], [0, 0, 1, 1], [], []>} : vector<2x8xf32>, vector<8x128xf32>, vector<2x128xf32> -> vector<2x128xf32>
    %c0_3 = arith.constant 0 : index
    %c0_4 = arith.constant 0 : index
    %3 = vector.load %arg4[%c0_3, %c0_4] : memref<1x128xf32, #tpu.memory_space<vmem>>, vector<1x128xf32>
    %4 = vector.broadcast %3 : vector<1x128xf32> to vector<2x128xf32>
    %5 = arith.addf %2, %4 : vector<2x128xf32>
    %cst_5 = arith.constant 0.000000e+00 : f32
    %6 = vector.broadcast %cst_5 : f32 to vector<2x128xf32>
    %7 = arith.maximumf %5, %6 : vector<2x128xf32>
    %c0_6 = arith.constant 0 : index
    %c0_7 = arith.constant 0 : index
    %8 = vector.load %arg5[%c0_6, %c0_7] : memref<128x16xf32, #tpu.memory_space<vmem>>, vector<128x16xf32>
    %cst_8 = arith.constant dense<0.000000e+00> : vector<2x16xf32>
    %9 = tpu.matmul %7, %8, %cst_8 {dimension_numbers = #tpu.dot_dimension_numbers<[1], [0], [0], [1], [0, 0, 1, 1], [], []>} : vector<2x128xf32>, vector<128x16xf32>, vector<2x16xf32> -> vector<2x16xf32>
    %c0_9 = arith.constant 0 : index
    %c0_10 = arith.constant 0 : index
    %10 = vector.load %arg6[%c0_9, %c0_10] : memref<1x16xf32, #tpu.memory_space<vmem>>, vector<1x16xf32>
    %11 = vector.broadcast %10 : vector<1x16xf32> to vector<2x16xf32>
    %12 = arith.addf %9, %11 : vector<2x16xf32>
    %cst_11 = arith.constant 0.000000e+00 : f32
    %13 = vector.broadcast %cst_11 : f32 to vector<2x16xf32>
    %14 = arith.maximumf %12, %13 : vector<2x16xf32>
    %c0_12 = arith.constant 0 : index
    %c0_13 = arith.constant 0 : index
    %15 = vector.load %arg1[%c0_12, %c0_13] : memref<2x128xf32, #tpu.memory_space<vmem>>, vector<2x128xf32>
    %c0_14 = arith.constant 0 : index
    %c0_15 = arith.constant 0 : index
    %16 = vector.load %arg7[%c0_14, %c0_15] : memref<128x128xf32, #tpu.memory_space<vmem>>, vector<128x128xf32>
    %cst_16 = arith.constant dense<0.000000e+00> : vector<2x128xf32>
    %17 = tpu.matmul %15, %16, %cst_16 {dimension_numbers = #tpu.dot_dimension_numbers<[1], [0], [0], [1], [0, 0, 1, 1], [], []>} : vector<2x128xf32>, vector<128x128xf32>, vector<2x128xf32> -> vector<2x128xf32>
    %c0_17 = arith.constant 0 : index
    %c0_18 = arith.constant 0 : index
    %18 = vector.load %arg8[%c0_17, %c0_18] : memref<16x128xf32, #tpu.memory_space<vmem>>, vector<16x128xf32>
    %cst_19 = arith.constant dense<0.000000e+00> : vector<2x128xf32>
    %19 = tpu.matmul %14, %18, %cst_19 {dimension_numbers = #tpu.dot_dimension_numbers<[1], [0], [0], [1], [0, 0, 1, 1], [], []>} : vector<2x16xf32>, vector<16x128xf32>, vector<2x128xf32> -> vector<2x128xf32>
    %20 = arith.addf %17, %19 : vector<2x128xf32>
    %c0_20 = arith.constant 0 : index
    %c0_21 = arith.constant 0 : index
    %21 = vector.load %arg9[%c0_20, %c0_21] : memref<1x128xf32, #tpu.memory_space<vmem>>, vector<1x128xf32>
    %22 = vector.broadcast %21 : vector<1x128xf32> to vector<2x128xf32>
    %23 = arith.addf %20, %22 : vector<2x128xf32>
    %cst_22 = arith.constant 0.000000e+00 : f32
    %24 = vector.broadcast %cst_22 : f32 to vector<2x128xf32>
    %25 = arith.cmpf ogt, %23, %24 : vector<2x128xf32>
    %cst_23 = arith.constant 0.000000e+00 : f32
    %26 = vector.broadcast %cst_23 : f32 to vector<2x128xf32>
    %27 = arith.minimumf %23, %26 : vector<2x128xf32>
    %28 = math.exp %27 : vector<2x128xf32>
    %cst_24 = arith.constant 1.000000e+00 : f32
    %29 = vector.broadcast %cst_24 : f32 to vector<2x128xf32>
    %30 = arith.subf %28, %29 : vector<2x128xf32>
    %31 = arith.select %25, %23, %30 : vector<2x128xi1>, vector<2x128xf32>
    %c0_25 = arith.constant 0 : index
    %c0_26 = arith.constant 0 : index
    %32 = vector.load %arg10[%c0_25, %c0_26] : memref<128x4xf32, #tpu.memory_space<vmem>>, vector<128x4xf32>
    %cst_27 = arith.constant dense<0.000000e+00> : vector<2x4xf32>
    %33 = tpu.matmul %31, %32, %cst_27 {dimension_numbers = #tpu.dot_dimension_numbers<[1], [0], [0], [1], [0, 0, 1, 1], [], []>} : vector<2x128xf32>, vector<128x4xf32>, vector<2x4xf32> -> vector<2x4xf32>
    %c0_28 = arith.constant 0 : index
    %c0_29 = arith.constant 0 : index
    %34 = vector.load %arg11[%c0_28, %c0_29] : memref<1x4xf32, #tpu.memory_space<vmem>>, vector<1x4xf32>
    %35 = vector.broadcast %34 : vector<1x4xf32> to vector<2x4xf32>
    %36 = arith.addf %33, %35 : vector<2x4xf32>
    %37 = math.tanh %36 : vector<2x4xf32>
    %c0_30 = arith.constant 0 : index
    %c0_31 = arith.constant 0 : index
    %38 = vector.load %arg12[%c0_30, %c0_31] : memref<2x4xf32, #tpu.memory_space<vmem>>, vector<2x4xf32>
    tpu.vector_store %arg12[%c0_30, %c0_31], %37 {strides = array<i32>} : memref<2x4xf32, #tpu.memory_space<vmem>>, vector<2x4xf32>,
    return
  }
  func.func @transform_0(%arg0: i32) -> (i32, i32) {
    %c0_i32 = arith.constant 0 : i32
    %c0_i32_0 = arith.constant 0 : i32
    %c0_i32_1 = arith.constant 0 : i32
    return %c0_i32, %c0_i32_0 : i32, i32
  }
  func.func @transform_1(%arg0: i32) -> (i32, i32) {
    %c0_i32 = arith.constant 0 : i32
    %c0_i32_0 = arith.constant 0 : i32
    %c0_i32_1 = arith.constant 0 : i32
    return %c0_i32, %c0_i32_0 : i32, i32
  }
  func.func @transform_2(%arg0: i32) -> (i32, i32) {
    %c0_i32 = arith.constant 0 : i32
    %c0_i32_0 = arith.constant 0 : i32
    %c0_i32_1 = arith.constant 0 : i32
    return %c0_i32, %c0_i32_0 : i32, i32
  }
  func.func @transform_3(%arg0: i32) -> (i32, i32) {
    %c0_i32 = arith.constant 0 : i32
    %c0_i32_0 = arith.constant 0 : i32
    %c0_i32_1 = arith.constant 0 : i32
    return %c0_i32, %c0_i32_0 : i32, i32
  }
  func.func @transform_4(%arg0: i32) -> (i32, i32) {
    %c0_i32 = arith.constant 0 : i32
    %c0_i32_0 = arith.constant 0 : i32
    %c0_i32_1 = arith.constant 0 : i32
    return %c0_i32, %c0_i32_0 : i32, i32
  }
  func.func @transform_5(%arg0: i32) -> (i32, i32) {
    %c0_i32 = arith.constant 0 : i32
    %c0_i32_0 = arith.constant 0 : i32
    %c0_i32_1 = arith.constant 0 : i32
    return %c0_i32, %c0_i32_0 : i32, i32
  }
  func.func @transform_6(%arg0: i32) -> (i32, i32) {
    %c0_i32 = arith.constant 0 : i32
    %c0_i32_0 = arith.constant 0 : i32
    %c0_i32_1 = arith.constant 0 : i32
    return %c0_i32, %c0_i32_0 : i32, i32
  }
  func.func @transform_7(%arg0: i32) -> (i32, i32) {
    %c0_i32 = arith.constant 0 : i32
    %c0_i32_0 = arith.constant 0 : i32
    %c0_i32_1 = arith.constant 0 : i32
    return %c0_i32, %c0_i32_0 : i32, i32
  }
  func.func @transform_8(%arg0: i32) -> (i32, i32) {
    %c0_i32 = arith.constant 0 : i32
    %c0_i32_0 = arith.constant 0 : i32
    %c0_i32_1 = arith.constant 0 : i32
    return %c0_i32, %c0_i32_0 : i32, i32
  }
  func.func @transform_9(%arg0: i32) -> (i32, i32) {
    %c0_i32 = arith.constant 0 : i32
    %c0_i32_0 = arith.constant 0 : i32
    %c0_i32_1 = arith.constant 0 : i32
    return %c0_i32, %c0_i32_0 : i32, i32
  }
  func.func @transform_10(%arg0: i32) -> (i32, i32) {
    %c0_i32 = arith.constant 0 : i32
    %c0_i32_0 = arith.constant 0 : i32
    %c0_i32_1 = arith.constant 0 : i32
    return %c0_i32, %c0_i32_0 : i32, i32
  }
  func.func @transform_11(%arg0: i32) -> (i32, i32) {
    %c0_i32 = arith.constant 0 : i32
    %c0_i32_0 = arith.constant 0 : i32
    %c0_i32_1 = arith.constant 0 : i32
    return %c0_i32, %c0_i32_0 : i32, i32
  }
}

</mosaic_0001>

<bundles_post_ra>
// kernel: actor_forward.4
= control target key start
LH: loop header
LB: loop body
LE: loop exit
PB: predicated region body
PF: predicated region fallthrough
CT: control target
= control target key end

     0   :  { %10 = vsyncpa [#allocation3], 0  ;;  %s603_s18 = smov [#allocation2]   ;;  %s805_s0 = inlined_call_operand.hbm [shape: f32[16,32], index: 0, kind: input, shape index: {}]   ;;  %s806_s1 = inlined_call_operand.vmem [shape: f32[32,578], index: 1, kind: input, shape index: {}]   ;;  %s807_s2 = inlined_call_operand.vmem [shape: f32[16,1], index: 2, kind: input, shape index: {}]   ;;  %s808_s3 = inlined_call_operand.vmem [shape: f32[16,1], index: 3, kind: input, shape index: {}]   ;;  %s809_s4 = inlined_call_operand.vmem [shape: f32[16,1], index: 4, kind: input, shape index: {}]   ;;  %s810_s5 = inlined_call_operand.vmem [shape: f32[16,578], index: 5, kind: output, shape index: {}]  }
   0x1   :  { %s16_s19 = sshll.u32 %s603_s18, 4  ;;  %s579_s22 = scalar_lea.hbm %s805_s0, 256  ;;  %s17_s19 = int_to_ptr.vmem [resolvable:$true] %s16_s19 }
   0x2   :  { %p580_p0 = scmp.ne.s32.totalorder %s805_s0, %s579_s22  ;;  %p583_p1 = scmp.lt.u32.totalorder %s579_s22, %s805_s0 }
   0x4   :  { %p585_p2 = pnand %p583_p1, %p580_p0 }
   0x6   :  { %588 = shalt.err (!%p585_p2)
}
   0x7   :  { %s589_s27 = scalar_lea.vmem %s17_s19, 256  ;;  %p594_p4 = scmp.lt.s32.totalorder %s17_s19, %s17_s19 }
   0x8   :  { %p590_p3 = scmp.ne.s32.totalorder %s17_s19, %s589_s27  ;;  %p595_p5 = scmp.lt.s32.totalorder %s589_s27, %s589_s27 }
   0xa   :  { %p596_p6 = por %p595_p5, %p594_p4 }
   0xc   :  { %p597_p7 = pnand %p596_p6, %p590_p3 }
   0xe   :  { %600 = shalt.err (!%p597_p7)
}
   0xf   :  { %s604_s28 = smov 128   ;;  %s605_s29 = smov 8  }
  0x10   :  { %22 = dma.hbm_to_vmem [thread:$0]  %s805_s0, 256, %s17_s19, [#allocation3], %s604_s28, %s604_s28, %s605_s29  }
  0x11   :  { %601 = dma.done.wait [#allocation3], 256  }
  0x12   :  { %602 = vsyncadd [#allocation3], 4294967040  ;;  %v606_v0 = vmov 0.0   ;;  %v607_v1 = vmov 0   ;;  %v37_v2 = vld [vmem:[%s806_s1 + $0x8] sm:$0xff]  ;;  %v42_v3 = vld [vmem:[%s806_s1 + $0x30] sm:$0xff] }
  0x13   :  { %139 = vmatprep.mubr.f32.mxu0 %v606_v0  ;;  %216 = vmatprep.mubr.f32.mxu1 %v606_v0  ;;  %v39_v4 = vld [vmem:[%s806_s1 + $0x18] sm:$0xff]  ;;  %v524_v5 = vpack.c.bf16 %v42_v3, %v37_v2  ;;  %v44_v6 = vld [vmem:[%s806_s1 + $0x40] sm:$0xff]  ;;  %v41_v8 = vld [vmem:[%s806_s1 + $0x28] sm:$0xff]  ;;  %vm68_vm0 = vcmask 261120   ;;  %vm307_vm1 = vcmask 539648  }
  0x14   :  { %553 = vset.pattern.permute.xlu0 %v607_v1  ;;  %554 = vset.pattern.permute.xlu1 %v607_v1  ;;  %v36_v7 = vld [vmem:[%s806_s1] sm:$0xff]  ;;  %v532_v9 = vpack.c.bf16 %v44_v6, %v39_v4  ;;  %v38_v11 = vld [vmem:[%s806_s1 + $0x10] sm:$0xff]  ;;  %v43_v12 = vld [vmem:[%s806_s1 + $0x38] sm:$0xff] }
  0x15   :  { %v526_v10 = vpack.c.bf16 %v41_v8, %v36_v7  ;;  %v47_v13 = vld [vmem:[%s806_s1 + $0x58] sm:$0xff]  ;;  %525 = vmatprep.subr.bf16.mxu0 %v524_v5  ;;  %v534_v14 = vpack.c.bf16 %v43_v12, %v38_v11  ;;  %v52_v15 = vld [vmem:[%s806_s1 + $0x80] sm:$0xff]  ;;  %v49_v16 = vld [vmem:[%s806_s1 + $0x68] sm:$0xff] }
  0x16   :  { %v54_v17 = vld [vmem:[%s806_s1 + $0x90] sm:$0xff]  ;;  %533 = vmatprep.subr.bf16.mxu1 %v532_v9  ;;  %v528_v18 = vpack.c.bf16 %v52_v15, %v47_v13  ;;  %v51_v21 = vld [vmem:[%s806_s1 + $0x78] sm:$0xff]  ;;  %v48_v22 = vld [vmem:[%s806_s1 + $0x60] sm:$0xff] }
  0x17   :  { %527 = vmatpush1.bf16.msra.mxu0 %v526_v10  ;;  %v536_v19 = vpack.c.bf16 %v54_v17, %v49_v16  ;;  %v46_v20 = vld [vmem:[%s806_s1 + $0x50] sm:$0xff]  ;;  %535 = vmatpush1.bf16.msra.mxu1 %v534_v14  ;;  %v53_v24 = vld [vmem:[%s806_s1 + $0x88] sm:$0xff]  ;;  %v40_v25 = vld [vmem:[%s806_s1 + $0x20] sm:$0xff] }
  0x18   :  { %v530_v23 = vpack.c.bf16 %v51_v21, %v46_v20  ;;  %529 = vmatprep.subr.bf16.mxu0 %v528_v18  ;;  %v538_v26 = vpack.c.bf16 %v53_v24, %v48_v22  ;;  %v45_v27 = vld [vmem:[%s806_s1 + $0x48] sm:$0xff]  ;;  %v50_v29 = vld [vmem:[%s806_s1 + $0x70] sm:$0xff]  ;;  %v55_v30 = vld [vmem:[%s806_s1 + $0x98] sm:$0xff] }
  0x19   :  { %537 = vmatprep.subr.bf16.mxu1 %v536_v19  ;;  %v540_v28 = vpack.c.bf16 %v45_v27, %v40_v25  ;;  %v56_v31 = vld [vmem:[%s807_s2] sm:$0xff]  ;;  %v544_v33 = vpack.c.bf16 %v55_v30, %v50_v29  ;;  %v57_v34 = vld [vmem:[%s807_s2 + $0x8] sm:$0xff] }
  0x1a   :  { %v34_v32 = vld [vmem:[#allocation2] sm:$0xff]  ;;  %60 = vperm.xlu0 %553, %v56_v31   ;;  %v35_v35 = vld [vmem:[#allocation2 + $0x8] sm:$0xff] }
  0x1b   :  { %531 = vmatpush1.bf16.msra.mxu0 %v530_v23  ;;  %539 = vmatpush1.bf16.msra.mxu1 %v538_v26  ;;  %v358_v4 = vld [vmem:[%s808_s3] sm:$0xff]  ;;  %v359_v5 = vld [vmem:[%s808_s3 + $0x8] sm:$0xff] }
  0x1c   :  { %541 = vmatprep.subr.bf16.mxu0 %v540_v28  ;;  %v394_v6 = vld [vmem:[%s809_s4] sm:$0xff] }
  0x1e   :  { %491 = vmatmul.mubr.msk.f32.vlgmr.msra.gmra.mrb[0].mxu0 %vm68_vm0, %v34_v32  ;;  %493 = vmatmul.mubr.msk.f32.vlgmr.msra.gmra.mrb[0].mxu1 %vm68_vm0, %v34_v32 }
  0x1f   :  { %543 = vmatpush3.bf16.msra.mxu0 %v540_v28  ;;  %145 = vmatprep.mubr.f32.mxu0 %v606_v0 }
  0x20   :  { %222 = vmatprep.mubr.f32.mxu1 %v606_v0  ;;  %545 = vmatprep.subr.bf16.mxu0 %v544_v33 }
  0x21   :  { %65 = vperm.xlu0 %553, %v57_v34  }
  0x22   :  { %492 = vmatmul.mubr.msk.f32.gmra.mrb[2].mxu0 %vm68_vm0, %v35_v35  ;;  %494 = vmatmul.mubr.msk.f32.gmra.mrb[2].mxu1 %vm68_vm0, %v35_v35 }
  0x23   :  { %547 = vmatpush3.bf16.msra.mxu0 %v544_v33  ;;  %521 = vmatprep.mubr.msk.f32.mxu0 %vm68_vm0, %v34_v32 }
  0x26   :  { %522 = vmatmul.mubr.msk.f32.vlgmr.msra.gmra.mrb[4].mxu0 %vm68_vm0, %v35_v35 }
  0x99   :  { %v61_v36 = vpop.permute.xlu0 %60 }
  0xa0   :  { %v66_v43 = vpop.permute.xlu0 %65 }
  0xf1   :  { %v141_v37 = vpop.f32.mrb[0].mxu0  ;;  %v218_v40 = vpop.f32.mrb[0].mxu1 }
  0xf2   :  { %v142_v38 = vadd.f32 %v141_v37, %v61_v36  ;;  %v143_v39 = vpop.f32.mrb[1].mxu0  ;;  %v220_v42 = vpop.f32.mrb[1].mxu1  ;;  %v219_v44 = vadd.f32 %v218_v40, %v61_v36 }
  0xf3   :  { %v144_v41 = vadd.f32 %v143_v39, %v61_v36  ;;  %v221_v53 = vadd.f32 %v220_v42, %v61_v36 }
  0xf5   :  { %v304_v45 = vadd.f32 %v144_v41, %v142_v38  ;;  %v147_v46 = vpop.f32.mrb[2].mxu0  ;;  %v224_v47 = vpop.f32.mrb[2].mxu1 }
  0xf6   :  { %v148_v48 = vadd.f32 %v147_v46, %v66_v43  ;;  %v149_v49 = vpop.f32.mrb[3].mxu0  ;;  %v226_v51 = vpop.f32.mrb[3].mxu1  ;;  %v225_v55 = vadd.f32 %v224_v47, %v66_v43 }
  0xf7   :  { %v150_v50 = vadd.f32 %v149_v49, %v66_v43  ;;  %v305_v52 = vadd.f32 %v304_v45, %v219_v44  ;;  %v227_v60 = vadd.f32 %v226_v51, %v66_v43 }
  0xf9   :  { %v312_v54 = vadd.f32 %v150_v50, %v148_v48  ;;  %v523_v56 = vpop.f32.mrb[4].mxu0  ;;  %v306_v61 = vadd.f32 %v305_v52, %v221_v53 }
  0xfa   :  { %v295_v57 = vpop.f32.mrb[5].mxu0  ;;  %v301_v62 = vadd.f32 %v523_v56, %v66_v43 }
  0xfb   :  { %v313_v58 = vadd.f32 %v312_v54, %v225_v55  ;;  %v296_v59 = vadd.f32 %v295_v57, %v61_v36 }
  0xfc   :  { %v315_v2 = vsel %vm307_vm1, %v301_v62, 0.0 }
  0xfd   :  { %v308_v63 = vsel %vm307_vm1, %v296_v59, 0.0  ;;  %v314_v0 = vadd.f32 %v313_v58, %v227_v60 }
  0xfe   :  { %v309_v1 = vadd.f32 %v308_v63, %v306_v61 }
  0xff   :  { %v316_v3 = vadd.f32 %v315_v2, %v314_v0 }
 0x100   :  { %310 = vadd.xlane.f32.xlu1 %v309_v1 }
 0x104   :  { %317 = vadd.xlane.f32.xlu1 %v316_v3 }
 0x115   :  { %376 = vperm.xlu1 %554, %v358_v4  }
 0x119   :  { %381 = vperm.xlu1 %554, %v359_v5  }
 0x11d   :  { %398 = vperm.xlu1 %554, %v394_v6  }
 0x18d   :  { %v311_v7 = vpop.xlane.xlu1 %310 }
 0x18e   :  { %v320_v8 = vmul.f32 0.0017301039, %v311_v7 }
 0x190   :  { %v322_v9 = vsub.f32 %v142_v38, %v320_v8  ;;  %v323_v10 = vsub.f32 %v144_v41, %v320_v8  ;;  %v324_v11 = vsub.f32 %v219_v44, %v320_v8  ;;  %v325_v13 = vsub.f32 %v221_v53, %v320_v8  ;;  %v395_v41 = vld [vmem:[%s809_s4 + $0x8] sm:$0xff] }
 0x191   :  { %v318_v12 = vpop.xlane.xlu1 %317  ;;  %v326_v14 = vsub.f32 %v296_v59, %v320_v8 }
 0x192   :  { %v321_v15 = vmul.f32 0.0017301039, %v318_v12  ;;  %v332_v16 = vmul.f32 %v322_v9, %v322_v9  ;;  %v333_v17 = vmul.f32 %v323_v10, %v323_v10  ;;  %v334_v18 = vmul.f32 %v324_v11, %v324_v11 }
 0x193   :  { %v335_v23 = vmul.f32 %v325_v13, %v325_v13  ;;  %v336_v24 = vmul.f32 %v326_v14, %v326_v14 }
 0x194   :  { %v342_v19 = vadd.f32 %v333_v17, %v332_v16  ;;  %v327_v20 = vsub.f32 %v148_v48, %v321_v15  ;;  %v328_v21 = vsub.f32 %v150_v50, %v321_v15  ;;  %v329_v22 = vsub.f32 %v225_v55, %v321_v15 }
 0x195   :  { %v331_v25 = vsub.f32 %v301_v62, %v321_v15  ;;  %v330_v27 = vsub.f32 %v227_v60, %v321_v15  ;;  %v345_v33 = vsel %vm307_vm1, %v336_v24, 0.0  ;;  %v377_v42 = vpop.permute.xlu1 %376 }
 0x196   :  { %v343_v26 = vadd.f32 %v342_v19, %v334_v18  ;;  %v337_v28 = vmul.f32 %v327_v20, %v327_v20  ;;  %v338_v29 = vmul.f32 %v328_v21, %v328_v21  ;;  %v339_v31 = vmul.f32 %v329_v22, %v329_v22 }
 0x197   :  { %v341_v34 = vmul.f32 %v331_v25, %v331_v25  ;;  %v340_v36 = vmul.f32 %v330_v27, %v330_v27 }
 0x198   :  { %v344_v30 = vadd.f32 %v343_v26, %v335_v23  ;;  %v349_v32 = vadd.f32 %v338_v29, %v337_v28 }
 0x199   :  { %v352_v39 = vsel %vm307_vm1, %v341_v34, 0.0  ;;  %v382_v43 = vpop.permute.xlu1 %381 }
 0x19a   :  { %v346_v35 = vadd.f32 %v345_v33, %v344_v30  ;;  %v350_v37 = vadd.f32 %v349_v32, %v339_v31 }
 0x19c   :  { %347 = vadd.xlane.f32.xlu0 %v346_v35  ;;  %v351_v38 = vadd.f32 %v350_v37, %v340_v36 }
 0x19d   :  { %v399_v44 = vpop.permute.xlu1 %398 }
 0x19e   :  { %v353_v40 = vadd.f32 %v352_v39, %v351_v38 }
 0x1a0   :  { %354 = vadd.xlane.f32.xlu1 %v353_v40 }
 0x1b1   :  { %403 = vperm.xlu1 %554, %v395_v41  }
 0x229   :  { %v348_v45 = vpop.xlane.xlu0 %347 }
 0x22a   :  { %v356_v46 = vmul.f32 0.0017301039, %v348_v45 }
 0x22c   :  { %v360_v47 = vadd.f32 1e-05, %v356_v46 }
 0x22d   :  { %v355_v48 = vpop.xlane.xlu1 %354 }
 0x22e   :  { %555 = vrsqrt.f32 %v360_v47  ;;  %v357_v49 = vmul.f32 0.0017301039, %v355_v48 }
 0x230   :  { %v361_v50 = vadd.f32 1e-05, %v357_v49 }
 0x232   :  { %557 = vrsqrt.f32 %v361_v50 }
 0x238   :  { %v556_v51 = vpop.eup %555 }
 0x239   :  { %v364_v52 = vmul.f32 %v556_v51, %v322_v9  ;;  %v365_v53 = vmul.f32 %v556_v51, %v323_v10  ;;  %v366_v54 = vmul.f32 %v556_v51, %v324_v11  ;;  %v367_v55 = vmul.f32 %v556_v51, %v325_v13 }
 0x23a   :  { %v368_v56 = vmul.f32 %v556_v51, %v326_v14 }
 0x23b   :  { %v384_v57 = vmul.f32 %v377_v42, %v364_v52  ;;  %v385_v58 = vmul.f32 %v377_v42, %v365_v53  ;;  %v386_v59 = vmul.f32 %v377_v42, %v366_v54  ;;  %v387_v60 = vmul.f32 %v377_v42, %v367_v55 }
 0x23c   :  { %v558_v61 = vpop.eup %557  ;;  %v388_v62 = vmul.f32 %v377_v42, %v368_v56 }
 0x23d   :  { %v406_v63 = vadd.f32 %v399_v44, %v384_v57  ;;  %v738_v0 = vadd.f32 %v399_v44, %v385_v58  ;;  %v740_v1 = vadd.f32 %v399_v44, %v386_v59  ;;  %v742_v2 = vadd.f32 %v399_v44, %v387_v60 }
 0x23e   :  { %v744_v3 = vadd.f32 %v399_v44, %v388_v62  ;;  %v369_v4 = vmul.f32 %v558_v61, %v327_v20  ;;  %v370_v5 = vmul.f32 %v558_v61, %v328_v21  ;;  %v371_v6 = vmul.f32 %v558_v61, %v329_v22  ;;  %v404_v22 = vpop.permute.xlu1 %403 }
 0x23f   :  { %v426_v7 = vmin.f32 %v406_v63, 0.0  ;;  %v427_v8 = vmin.f32 %v738_v0, 0.0  ;;  %v428_v9 = vmin.f32 %v740_v1, 0.0  ;;  %v429_v10 = vmin.f32 %v742_v2, 0.0 }
 0x240   :  { %v430_v11 = vmin.f32 %v744_v3, 0.0  ;;  %v372_v12 = vmul.f32 %v558_v61, %v330_v27  ;;  %v373_v13 = vmul.f32 %v558_v61, %v331_v25  ;;  %v389_v17 = vmul.f32 %v382_v43, %v369_v4 }
 0x241   :  { %v436_v14 = vmul.f32 1.442695, %v426_v7  ;;  %v438_v15 = vmul.f32 1.442695, %v427_v8  ;;  %v440_v16 = vmul.f32 1.442695, %v428_v9  ;;  %v390_v20 = vmul.f32 %v382_v43, %v370_v5 }
 0x242   :  { %v442_v18 = vmul.f32 1.442695, %v429_v10  ;;  %v444_v19 = vmul.f32 1.442695, %v430_v11  ;;  %v391_v21 = vmul.f32 %v382_v43, %v371_v6  ;;  %v392_v23 = vmul.f32 %v382_v43, %v372_v12 }
 0x243   :  { %559 = vpow2.f32 %v436_v14  ;;  %v393_v24 = vmul.f32 %v382_v43, %v373_v13  ;;  %v411_v26 = vadd.f32 %v404_v22, %v389_v17  ;;  %v412_v28 = vadd.f32 %v404_v22, %v390_v20 }
 0x244   :  { %561 = vpow2.f32 %v438_v15  ;;  %v750_v29 = vadd.f32 %v404_v22, %v391_v21  ;;  %v752_v27 = vadd.f32 %v404_v22, %v392_v23  ;;  %vm416_vm2 = vcmp.gt.f32.partialorder %v406_v63, 0.0 }
 0x245   :  { %563 = vpow2.f32 %v440_v16  ;;  %v754_v25 = vadd.f32 %v404_v22, %v393_v24  ;;  %v431_v30 = vmin.f32 %v411_v26, 0.0  ;;  %v432_v31 = vmin.f32 %v412_v28, 0.0 }
 0x246   :  { %565 = vpow2.f32 %v442_v18  ;;  %v433_v32 = vmin.f32 %v750_v29, 0.0  ;;  %v434_v33 = vmin.f32 %v752_v27, 0.0  ;;  %vm417_vm3 = vcmp.gt.f32.partialorder %v738_v0, 0.0 }
 0x247   :  { %567 = vpow2.f32 %v444_v19  ;;  %v435_v34 = vmin.f32 %v754_v25, 0.0  ;;  %v446_v35 = vmul.f32 1.442695, %v431_v30  ;;  %v448_v36 = vmul.f32 1.442695, %v432_v31 }
 0x248   :  { %v450_v37 = vmul.f32 1.442695, %v433_v32  ;;  %v452_v38 = vmul.f32 1.442695, %v434_v33  ;;  %vm418_vm4 = vcmp.gt.f32.partialorder %v740_v1, 0.0  ;;  %vm419_vm5 = vcmp.gt.f32.partialorder %v742_v2, 0.0 }
 0x249   :  { %569 = vpow2.f32 %v446_v35  ;;  %v454_v39 = vmul.f32 1.442695, %v435_v34  ;;  %vm420_vm6 = vcmp.gt.f32.partialorder %v744_v3, 0.0  ;;  %vm421_vm7 = vcmp.gt.f32.partialorder %v411_v26, 0.0 }
 0x24a   :  { %571 = vpow2.f32 %v448_v36  ;;  %vm422_vm8 = vcmp.gt.f32.partialorder %v412_v28, 0.0  ;;  %vm423_vm9 = vcmp.gt.f32.partialorder %v750_v29, 0.0  ;;  %vm424_vm10 = vcmp.gt.f32.partialorder %v752_v27, 0.0 }
 0x24b   :  { %573 = vpow2.f32 %v450_v37  ;;  %vm425_vm11 = vcmp.gt.f32.partialorder %v754_v25, 0.0 }
 0x24c   :  { %575 = vpow2.f32 %v452_v38 }
 0x24d   :  { %v560_v40 = vpop.eup %559  ;;  %577 = vpow2.f32 %v454_v39 }
 0x24e   :  { %v562_v41 = vpop.eup %561  ;;  %v497_v42 = vadd.f32 -1.0, %v560_v40 }
 0x24f   :  { %v564_v43 = vpop.eup %563  ;;  %v498_v44 = vadd.f32 -1.0, %v562_v41 }
 0x250   :  { %v566_v45 = vpop.eup %565  ;;  %v499_v46 = vadd.f32 -1.0, %v564_v43  ;;  %v466_v47 = vsel %vm416_vm2, %v406_v63, %v497_v42 }
 0x251   :  { %v568_v48 = vpop.eup %567  ;;  %v500_v49 = vadd.f32 -1.0, %v566_v45  ;;  %v467_v50 = vsel %vm417_vm3, %v738_v0, %v498_v44  ;;  %476 = vst [vmem:[%s810_s5] sm:$0xff] %v466_v47 }
 0x252   :  { %v501_v51 = vadd.f32 -1.0, %v568_v48  ;;  %v468_v52 = vsel %vm418_vm4, %v740_v1, %v499_v46  ;;  %477 = vst [vmem:[%s810_s5 + $0x8] sm:$0xff] %v467_v50 }
 0x253   :  { %v469_v53 = vsel %vm419_vm5, %v742_v2, %v500_v49  ;;  %478 = vst [vmem:[%s810_s5 + $0x10] sm:$0xff] %v468_v52  ;;  %v570_v54 = vpop.eup %569 }
 0x254   :  { %v470_v55 = vsel %vm420_vm6, %v744_v3, %v501_v51  ;;  %479 = vst [vmem:[%s810_s5 + $0x18] sm:$0xff] %v469_v53  ;;  %v572_v56 = vpop.eup %571  ;;  %v502_v57 = vadd.f32 -1.0, %v570_v54 }
 0x255   :  { %480 = vst.msk [vmem:[%s810_s5 + $0x20] sm:$0xff] %vm307_vm1, %v470_v55  ;;  %v574_v58 = vpop.eup %573  ;;  %v503_v59 = vadd.f32 -1.0, %v572_v56 }
 0x256   :  { %v576_v60 = vpop.eup %575  ;;  %v504_v61 = vadd.f32 -1.0, %v574_v58  ;;  %v471_v62 = vsel %vm421_vm7, %v411_v26, %v502_v57 }
 0x257   :  { %v578_v63 = vpop.eup %577  ;;  %v505_v0 = vadd.f32 -1.0, %v576_v60  ;;  %v472_v1 = vsel %vm422_vm8, %v412_v28, %v503_v59  ;;  %481 = vst [vmem:[%s810_s5 + $0x28] sm:$0xff] %v471_v62 }
 0x258   :  { %v506_v2 = vadd.f32 -1.0, %v578_v63  ;;  %v473_v3 = vsel %vm423_vm9, %v750_v29, %v504_v61  ;;  %482 = vst [vmem:[%s810_s5 + $0x30] sm:$0xff] %v472_v1 }
 0x259   :  { %v474_v4 = vsel %vm424_vm10, %v752_v27, %v505_v0  ;;  %483 = vst [vmem:[%s810_s5 + $0x38] sm:$0xff] %v473_v3 }
 0x25a   :  { %v475_v5 = vsel %vm425_vm11, %v754_v25, %v506_v2  ;;  %484 = vst [vmem:[%s810_s5 + $0x40] sm:$0xff] %v474_v4 }
 0x25b   :  { %485 = vst.msk [vmem:[%s810_s5 + $0x48] sm:$0xff] %vm307_vm1, %v475_v5 }
 0x25c   :  { %490 = vsyncpa [#allocation3], 1 }

// kernel: actor_forward.5
= control target key start
LH: loop header
LB: loop body
LE: loop exit
PB: predicated region body
PF: predicated region fallthrough
CT: control target
= control target key end

     0   :  { %v566_v2 = vmov 0.0|0.0   ;;  %v567_v4 = vmov 0   ;;  %vm110_vm0 = vcmask 130048   ;;  %vm293_vm1 = vcmask 801792   ;;  %s869_s1 = inlined_call_operand.vmem [shape: f32[400,98], index: 1, kind: input, shape index: {}]   ;;  %s870_s0 = inlined_call_operand.vmem [shape: f32[32,400], index: 0, kind: input, shape index: {}]   ;;  %s871_s2 = inlined_call_operand.vmem [shape: f32[32,1], index: 2, kind: input, shape index: {}]   ;;  %s872_s3 = inlined_call_operand.vmem [shape: f32[32,1], index: 3, kind: input, shape index: {}]   ;;  %s873_s4 = inlined_call_operand.vmem [shape: f32[32,1], index: 4, kind: input, shape index: {}]   ;;  %s874_s5 = inlined_call_operand.vmem [shape: f32[32,98], index: 5, kind: output, shape index: {}]  }
   0x1   :  { %v52_v0 = vld [vmem:[%s869_s1 + $0x80] sm:$0xff]  ;;  %v53_v1 = vld [vmem:[%s869_s1 + $0x88] sm:$0xff]  ;;  %519 = vmatprep.subr.bf16.mxu1 %v566_v2  ;;  %548 = vset.pattern.permute.xlu0 %v567_v4  ;;  %v54_v11 = vld [vmem:[%s869_s1 + $0x90] sm:$0xff] }
   0x2   :  { %v36_v3 = vld [vmem:[%s869_s1] sm:$0xff]  ;;  %v487_v5 = vpack.c.bf16 %v53_v1, %v52_v0  ;;  %v37_v6 = vld [vmem:[%s869_s1 + $0x8] sm:$0xff]  ;;  %549 = vset.pattern.permute.xlu1 %v567_v4  ;;  %v55_v12 = vld [vmem:[%s869_s1 + $0x98] sm:$0xff] }
   0x3   :  { %v68_v7 = vld [vmem:[%s869_s1 + $0x100] sm:$0xff]  ;;  %v69_v8 = vld [vmem:[%s869_s1 + $0x108] sm:$0xff]  ;;  %v489_v9 = vpack.c.bf16 %v37_v6, %v36_v3  ;;  %v38_v13 = vld [vmem:[%s869_s1 + $0x10] sm:$0xff]  ;;  %v491_v14 = vpack.c.bf16 %v55_v12, %v54_v11 }
   0x4   :  { %v520_v10 = vpack.c.bf16 %v69_v8, %v68_v7  ;;  %488 = vmatprep.subr.bf16.mxu0 %v487_v5  ;;  %v39_v15 = vld [vmem:[%s869_s1 + $0x18] sm:$0xff]  ;;  %v70_v16 = vld [vmem:[%s869_s1 + $0x110] sm:$0xff]  ;;  %v56_v20 = vld [vmem:[%s869_s1 + $0xa0] sm:$0xff] }
   0x5   :  { %v71_v17 = vld [vmem:[%s869_s1 + $0x118] sm:$0xff]  ;;  %490 = vmatpush3.bf16.msra.mxu0 %v489_v9  ;;  %v493_v18 = vpack.c.bf16 %v39_v15, %v38_v13  ;;  %v57_v21 = vld [vmem:[%s869_s1 + $0xa8] sm:$0xff]  ;;  %v40_v22 = vld [vmem:[%s869_s1 + $0x20] sm:$0xff] }
   0x6   :  { %521 = vmatpush1.bf16.msra.mxu1 %v520_v10  ;;  %v523_v19 = vpack.c.bf16 %v71_v17, %v70_v16  ;;  %492 = vmatprep.subr.bf16.mxu0 %v491_v14  ;;  %v495_v23 = vpack.c.bf16 %v57_v21, %v56_v20  ;;  %v41_v24 = vld [vmem:[%s869_s1 + $0x28] sm:$0xff]  ;;  %v72_v25 = vld [vmem:[%s869_s1 + $0x120] sm:$0xff]  ;;  %v58_v27 = vld [vmem:[%s869_s1 + $0xb0] sm:$0xff] }
   0x7   :  { %522 = vmatprep.subr.bf16.mxu1 %v566_v2  ;;  %v73_v26 = vld [vmem:[%s869_s1 + $0x128] sm:$0xff]  ;;  %v59_v28 = vld [vmem:[%s869_s1 + $0xb8] sm:$0xff]  ;;  %v497_v29 = vpack.c.bf16 %v41_v24, %v40_v22  ;;  %v42_v31 = vld [vmem:[%s869_s1 + $0x30] sm:$0xff] }
   0x8   :  { %v526_v30 = vpack.c.bf16 %v73_v26, %v72_v25  ;;  %v499_v32 = vpack.c.bf16 %v59_v28, %v58_v27  ;;  %v43_v33 = vld [vmem:[%s869_s1 + $0x38] sm:$0xff]  ;;  %v74_v34 = vld [vmem:[%s869_s1 + $0x130] sm:$0xff]  ;;  %v60_v36 = vld [vmem:[%s869_s1 + $0xc0] sm:$0xff] }
   0x9   :  { %494 = vmatpush3.bf16.msra.mxu0 %v493_v18  ;;  %v75_v35 = vld [vmem:[%s869_s1 + $0x138] sm:$0xff]  ;;  %v61_v37 = vld [vmem:[%s869_s1 + $0xc8] sm:$0xff]  ;;  %v501_v38 = vpack.c.bf16 %v43_v33, %v42_v31  ;;  %v44_v40 = vld [vmem:[%s869_s1 + $0x40] sm:$0xff] }
   0xa   :  { %524 = vmatpush1.bf16.msra.mxu1 %v523_v19  ;;  %496 = vmatprep.subr.bf16.mxu0 %v495_v23  ;;  %v529_v39 = vpack.c.bf16 %v75_v35, %v74_v34  ;;  %v503_v41 = vpack.c.bf16 %v61_v37, %v60_v36  ;;  %v45_v42 = vld [vmem:[%s869_s1 + $0x48] sm:$0xff]  ;;  %v76_v43 = vld [vmem:[%s869_s1 + $0x140] sm:$0xff]  ;;  %v62_v45 = vld [vmem:[%s869_s1 + $0xd0] sm:$0xff] }
   0xb   :  { %525 = vmatprep.subr.bf16.mxu1 %v566_v2  ;;  %v77_v44 = vld [vmem:[%s869_s1 + $0x148] sm:$0xff]  ;;  %v63_v46 = vld [vmem:[%s869_s1 + $0xd8] sm:$0xff]  ;;  %v505_v47 = vpack.c.bf16 %v45_v42, %v44_v40  ;;  %v46_v49 = vld [vmem:[%s869_s1 + $0x50] sm:$0xff] }
   0xc   :  { %v532_v48 = vpack.c.bf16 %v77_v44, %v76_v43  ;;  %v47_v50 = vld [vmem:[%s869_s1 + $0x58] sm:$0xff]  ;;  %v21_v51 = vld [vmem:[%s870_s0 + $0x8] sm:$0xff]  ;;  %v507_v52 = vpack.c.bf16 %v63_v46, %v62_v45  ;;  %v78_v53 = vld [vmem:[%s869_s1 + $0x150] sm:$0xff] }
   0xd   :  { %498 = vmatpush3.bf16.msra.mxu0 %v497_v29  ;;  %v79_v54 = vld [vmem:[%s869_s1 + $0x158] sm:$0xff]  ;;  %v64_v56 = vld [vmem:[%s869_s1 + $0xe0] sm:$0xff]  ;;  %v65_v57 = vld [vmem:[%s869_s1 + $0xe8] sm:$0xff]  ;;  %187 = vmatprep.mubr.f32.mxu0 %v21_v51  ;;  %v509_v58 = vpack.c.bf16 %v47_v50, %v46_v49 }
   0xe   :  { %527 = vmatpush1.bf16.msra.mxu1 %v526_v30  ;;  %500 = vmatprep.subr.bf16.mxu0 %v499_v32  ;;  %v23_v55 = vld [vmem:[%s870_s0 + $0x18] sm:$0xff]  ;;  %v535_v59 = vpack.c.bf16 %v79_v54, %v78_v53  ;;  %v48_v60 = vld [vmem:[%s869_s1 + $0x60] sm:$0xff]  ;;  %v49_v61 = vld [vmem:[%s869_s1 + $0x68] sm:$0xff]  ;;  %v511_v62 = vpack.c.bf16 %v65_v57, %v64_v56 }
   0xf   :  { %528 = vmatprep.subr.bf16.mxu1 %v566_v2  ;;  %435 = vmatprep.mubr.msk.f32.mxu1 %vm110_vm0, %v23_v55  ;;  %v80_v63 = vld [vmem:[%s869_s1 + $0x160] sm:$0xff]  ;;  %v81_v0 = vld [vmem:[%s869_s1 + $0x168] sm:$0xff]  ;;  %v66_v1 = vld [vmem:[%s869_s1 + $0xf0] sm:$0xff]  ;;  %v513_v6 = vpack.c.bf16 %v49_v61, %v48_v60 }
  0x10   :  { %v67_v3 = vld [vmem:[%s869_s1 + $0xf8] sm:$0xff]  ;;  %v86_v4 = vld [vmem:[%s871_s2] sm:$0xff]  ;;  %v88_v5 = vld [vmem:[%s871_s2 + $0x10] sm:$0xff]  ;;  %v538_v7 = vpack.c.bf16 %v81_v0, %v80_v63 }
  0x11   :  { %502 = vmatpush3.bf16.msra.mxu0 %v501_v38  ;;  %92 = vperm.xlu0 %548, %v86_v4   ;;  %v50_v8 = vld [vmem:[%s869_s1 + $0x70] sm:$0xff]  ;;  %v87_v9 = vld [vmem:[%s871_s2 + $0x8] sm:$0xff]  ;;  %v89_v10 = vld [vmem:[%s871_s2 + $0x18] sm:$0xff]  ;;  %v515_v11 = vpack.c.bf16 %v67_v3, %v66_v1 }
  0x12   :  { %530 = vmatpush1.bf16.msra.mxu1 %v529_v39  ;;  %504 = vmatprep.subr.bf16.mxu0 %v503_v41  ;;  %v51_v12 = vld [vmem:[%s869_s1 + $0x78] sm:$0xff]  ;;  %v82_v13 = vld [vmem:[%s869_s1 + $0x170] sm:$0xff]  ;;  %v84_v17 = vld [vmem:[%s869_s1 + $0x180] sm:$0xff] }
  0x13   :  { %531 = vmatprep.subr.bf16.mxu1 %v566_v2  ;;  %102 = vperm.xlu1 %549, %v88_v5   ;;  %v83_v14 = vld [vmem:[%s869_s1 + $0x178] sm:$0xff]  ;;  %v517_v15 = vpack.c.bf16 %v51_v12, %v50_v8  ;;  %v85_v18 = vld [vmem:[%s869_s1 + $0x188] sm:$0xff]  ;;  %v20_v19 = vld [vmem:[%s870_s0] sm:$0xff] }
  0x14   :  { %v541_v16 = vpack.c.bf16 %v83_v14, %v82_v13  ;;  %v544_v20 = vpack.c.bf16 %v85_v18, %v84_v17  ;;  %v25_v21 = vld [vmem:[%s870_s0 + $0x28] sm:$0xff]  ;;  %v24_v22 = vld [vmem:[%s870_s0 + $0x20] sm:$0xff]  ;;  %v22_v23 = vld [vmem:[%s870_s0 + $0x10] sm:$0xff] }
  0x15   :  { %506 = vmatpush3.bf16.msra.mxu0 %v505_v47  ;;  %97 = vperm.xlu0 %548, %v87_v9   ;;  %v29_v24 = vld [vmem:[%s870_s0 + $0x48] sm:$0xff]  ;;  %v28_v25 = vld [vmem:[%s870_s0 + $0x40] sm:$0xff]  ;;  %v26_v26 = vld [vmem:[%s870_s0 + $0x30] sm:$0xff] }
  0x16   :  { %533 = vmatpush1.bf16.msra.mxu1 %v532_v48  ;;  %508 = vmatprep.subr.bf16.mxu0 %v507_v52  ;;  %v33_v27 = vld [vmem:[%s870_s0 + $0x68] sm:$0xff]  ;;  %v31_v28 = vld [vmem:[%s870_s0 + $0x58] sm:$0xff]  ;;  %v32_v29 = vld [vmem:[%s870_s0 + $0x60] sm:$0xff] }
  0x17   :  { %534 = vmatprep.subr.bf16.mxu1 %v566_v2  ;;  %107 = vperm.xlu1 %549, %v89_v10   ;;  %v30_v30 = vld [vmem:[%s870_s0 + $0x50] sm:$0xff]  ;;  %v35_v31 = vld [vmem:[%s870_s0 + $0x78] sm:$0xff]  ;;  %v376_v9 = vld [vmem:[%s873_s4 + $0x8] sm:$0xff] }
  0x18   :  { %v34_v32 = vld [vmem:[%s870_s0 + $0x70] sm:$0xff]  ;;  %v338_v8 = vld [vmem:[%s872_s3 + $0x18] sm:$0xff]  ;;  %v336_v10 = vld [vmem:[%s872_s3 + $0x8] sm:$0xff] }
  0x19   :  { %510 = vmatpush3.bf16.msra.mxu0 %v509_v58 }
  0x1a   :  { %536 = vmatpush1.bf16.msra.mxu1 %v535_v59  ;;  %512 = vmatprep.subr.bf16.mxu0 %v511_v62 }
  0x1b   :  { %537 = vmatprep.subr.bf16.mxu1 %v566_v2 }
  0x1d   :  { %514 = vmatpush3.bf16.msra.mxu0 %v513_v6  ;;  %v335_v6 = vld [vmem:[%s872_s3] sm:$0xff] }
  0x1e   :  { %539 = vmatpush1.bf16.msra.mxu1 %v538_v7  ;;  %516 = vmatprep.subr.bf16.mxu0 %v515_v11  ;;  %v337_v7 = vld [vmem:[%s872_s3 + $0x10] sm:$0xff]  ;;  %v375_v11 = vld [vmem:[%s873_s4] sm:$0xff] }
  0x1f   :  { %540 = vmatprep.subr.bf16.mxu1 %v566_v2 }
  0x21   :  { %518 = vmatpush3.bf16.msra.mxu0 %v517_v15 }
  0x22   :  { %542 = vmatpush1.bf16.msra.mxu1 %v541_v16 }
  0x23   :  { %543 = vmatprep.subr.bf16.mxu1 %v566_v2  ;;  %v27_v2 = vld [vmem:[%s870_s0 + $0x38] sm:$0xff] }
  0x24   :  { %188 = vmatmul.mubr.f32.vlgmr.msra.gmra.mrb[0].mxu0 %v20_v19 }
  0x25   :  { %192 = vmatprep.mubr.f32.mxu0 %v25_v21 }
  0x26   :  { %545 = vmatpush1.bf16.msra.mxu1 %v544_v20 }
  0x28   :  { %193 = vmatmul.mubr.f32.gmra.mrb[2].mxu0 %v24_v22 }
  0x29   :  { %273 = vmatmul.mubr.f32.vlgmr.msra.gmra.mrb[0].mxu1 %v22_v23  ;;  %197 = vmatprep.mubr.f32.mxu0 %v29_v24 }
  0x2a   :  { %436 = vmatprep.mubr.msk.f32.mxu1 %vm110_vm0, %v27_v2 }
  0x2c   :  { %198 = vmatmul.mubr.f32.gmra.mrb[4].mxu0 %v28_v25 }
  0x2d   :  { %278 = vmatmul.mubr.f32.gmra.mrb[2].mxu1 %v26_v26  ;;  %202 = vmatprep.mubr.f32.mxu0 %v33_v27 }
  0x2e   :  { %437 = vmatprep.mubr.msk.f32.mxu1 %vm110_vm0, %v31_v28 }
  0x30   :  { %203 = vmatmul.mubr.f32.gmra.mrb[6].mxu0 %v32_v29 }
  0x31   :  { %283 = vmatmul.mubr.f32.gmra.mrb[4].mxu1 %v30_v30 }
  0x32   :  { %438 = vmatprep.mubr.msk.f32.mxu1 %vm110_vm0, %v35_v31  ;;  %v378_v31 = vld [vmem:[%s873_s4 + $0x18] sm:$0xff] }
  0x35   :  { %288 = vmatmul.mubr.f32.gmra.mrb[6].mxu1 %v34_v32  ;;  %v377_v32 = vld [vmem:[%s873_s4 + $0x10] sm:$0xff] }
  0x90   :  { %v93_v33 = vpop.permute.xlu0 %92 }
  0x92   :  { %v103_v45 = vpop.permute.xlu1 %102 }
  0x94   :  { %v98_v37 = vpop.permute.xlu0 %97 }
  0x96   :  { %v108_v62 = vpop.permute.xlu1 %107 }
  0xf7   :  { %v475_v34 = vpop.f32.mrb[0].mxu0 }
  0xf8   :  { %v476_v35 = vpop.f32.mrb[1].mxu0 }
  0xf9   :  { %v477_v36 = vadd.f32 %v476_v35, %v475_v34 }
  0xfb   :  { %v190_v38 = vadd.f32 %v477_v36, %v93_v33  ;;  %v478_v39 = vpop.f32.mrb[2].mxu0 }
  0xfc   :  { %v274_v40 = vpop.f32.mrb[0].mxu1  ;;  %v479_v41 = vpop.f32.mrb[3].mxu0 }
  0xfd   :  { %v276_v42 = vpop.f32.mrb[1].mxu1  ;;  %v275_v43 = vadd.f32 %v274_v40, %v190_v38  ;;  %v480_v44 = vadd.f32 %v479_v41, %v478_v39 }
  0xff   :  { %v195_v46 = vadd.f32 %v480_v44, %v98_v37  ;;  %v481_v47 = vpop.f32.mrb[4].mxu0  ;;  %v294_v49 = vsel %vm293_vm1, %v275_v43, 0.0 }
 0x100   :  { %v279_v48 = vpop.f32.mrb[2].mxu1  ;;  %v482_v50 = vpop.f32.mrb[5].mxu0  ;;  %295 = vadd.xlane.f32.xlu0 %v294_v49 }
 0x101   :  { %v281_v51 = vpop.f32.mrb[3].mxu1  ;;  %v280_v52 = vadd.f32 %v279_v48, %v195_v46  ;;  %v483_v53 = vadd.f32 %v482_v50, %v481_v47 }
 0x103   :  { %v484_v54 = vpop.f32.mrb[6].mxu0  ;;  %v200_v55 = vadd.f32 %v483_v53, %v103_v45  ;;  %v297_v57 = vsel %vm293_vm1, %v280_v52, 0.0 }
 0x104   :  { %v284_v56 = vpop.f32.mrb[4].mxu1  ;;  %v485_v58 = vpop.f32.mrb[7].mxu0  ;;  %298 = vadd.xlane.f32.xlu1 %v297_v57 }
 0x105   :  { %v286_v59 = vpop.f32.mrb[5].mxu1  ;;  %v285_v60 = vadd.f32 %v284_v56, %v200_v55  ;;  %v486_v61 = vadd.f32 %v485_v58, %v484_v54 }
 0x107   :  { %v205_v63 = vadd.f32 %v486_v61, %v108_v62  ;;  %v300_v1 = vsel %vm293_vm1, %v285_v60, 0.0 }
 0x108   :  { %v289_v0 = vpop.f32.mrb[6].mxu1  ;;  %301 = vadd.xlane.f32.xlu0 %v300_v1 }
 0x109   :  { %v291_v3 = vpop.f32.mrb[7].mxu1  ;;  %v290_v4 = vadd.f32 %v289_v0, %v205_v63 }
 0x10b   :  { %v303_v5 = vsel %vm293_vm1, %v290_v4, 0.0 }
 0x10c   :  { %304 = vadd.xlane.f32.xlu0 %v303_v5 }
 0x115   :  { %353 = vperm.xlu1 %549, %v335_v6  }
 0x119   :  { %363 = vperm.xlu1 %549, %v337_v7  }
 0x11d   :  { %368 = vperm.xlu1 %549, %v338_v8  }
 0x121   :  { %386 = vperm.xlu1 %549, %v376_v9  }
 0x122   :  { %358 = vperm.xlu0 %548, %v336_v10  }
 0x126   :  { %381 = vperm.xlu0 %548, %v375_v11  }
 0x18d   :  { %v296_v12 = vpop.xlane.xlu0 %295 }
 0x18e   :  { %v307_v13 = vmul.f32 0.010204081, %v296_v12 }
 0x190   :  { %v311_v14 = vsub.f32 %v275_v43, %v307_v13 }
 0x191   :  { %v299_v15 = vpop.xlane.xlu1 %298 }
 0x192   :  { %v308_v16 = vmul.f32 0.010204081, %v299_v15  ;;  %v315_v17 = vmul.f32 %v311_v14, %v311_v14 }
 0x194   :  { %v312_v18 = vsub.f32 %v280_v52, %v308_v16  ;;  %v319_v19 = vsel %vm293_vm1, %v315_v17, 0.0 }
 0x195   :  { %320 = vadd.xlane.f32.xlu1 %v319_v19  ;;  %v302_v20 = vpop.xlane.xlu0 %301  ;;  %v354_v33 = vpop.permute.xlu1 %353 }
 0x196   :  { %v309_v21 = vmul.f32 0.010204081, %v302_v20  ;;  %v316_v22 = vmul.f32 %v312_v18, %v312_v18 }
 0x198   :  { %v313_v23 = vsub.f32 %v285_v60, %v309_v21  ;;  %v322_v24 = vsel %vm293_vm1, %v316_v22, 0.0 }
 0x199   :  { %323 = vadd.xlane.f32.xlu0 %v322_v24  ;;  %v305_v2 = vpop.xlane.xlu0 %304  ;;  %v364_v34 = vpop.permute.xlu1 %363 }
 0x19a   :  { %v310_v25 = vmul.f32 0.010204081, %v305_v2  ;;  %v317_v26 = vmul.f32 %v313_v23, %v313_v23 }
 0x19c   :  { %v314_v27 = vsub.f32 %v290_v4, %v310_v25  ;;  %v325_v28 = vsel %vm293_vm1, %v317_v26, 0.0 }
 0x19d   :  { %326 = vadd.xlane.f32.xlu1 %v325_v28  ;;  %v369_v35 = vpop.permute.xlu1 %368 }
 0x19e   :  { %v318_v29 = vmul.f32 %v314_v27, %v314_v27 }
 0x1a0   :  { %v328_v30 = vsel %vm293_vm1, %v318_v29, 0.0 }
 0x1a1   :  { %329 = vadd.xlane.f32.xlu0 %v328_v30  ;;  %v359_v36 = vpop.permute.xlu0 %358  ;;  %v387_v37 = vpop.permute.xlu1 %386 }
 0x1a5   :  { %v382_v38 = vpop.permute.xlu0 %381 }
 0x1ae   :  { %396 = vperm.xlu1 %549, %v378_v31  }
 0x1b7   :  { %391 = vperm.xlu0 %548, %v377_v32  }
 0x222   :  { %v321_v39 = vpop.xlane.xlu1 %320 }
 0x223   :  { %v331_v40 = vmul.f32 0.010204081, %v321_v39 }
 0x225   :  { %v339_v41 = vadd.f32 1e-05, %v331_v40 }
 0x226   :  { %v324_v42 = vpop.xlane.xlu0 %323 }
 0x227   :  { %550 = vrsqrt.f32 %v339_v41  ;;  %v332_v43 = vmul.f32 0.010204081, %v324_v42 }
 0x229   :  { %v340_v44 = vadd.f32 1e-05, %v332_v43 }
 0x22a   :  { %v327_v45 = vpop.xlane.xlu1 %326 }
 0x22b   :  { %552 = vrsqrt.f32 %v340_v44  ;;  %v333_v46 = vmul.f32 0.010204081, %v327_v45 }
 0x22d   :  { %v341_v47 = vadd.f32 1e-05, %v333_v46 }
 0x22e   :  { %v330_v48 = vpop.xlane.xlu0 %329  ;;  %v397_v9 = vpop.permute.xlu1 %396 }
 0x22f   :  { %554 = vrsqrt.f32 %v341_v47  ;;  %v334_v49 = vmul.f32 0.010204081, %v330_v48 }
 0x231   :  { %v551_v50 = vpop.eup %550  ;;  %v342_v51 = vadd.f32 1e-05, %v334_v49 }
 0x232   :  { %v347_v52 = vmul.f32 %v551_v50, %v311_v14 }
 0x233   :  { %556 = vrsqrt.f32 %v342_v51 }
 0x234   :  { %v371_v53 = vmul.f32 %v354_v33, %v347_v52 }
 0x235   :  { %v553_v54 = vpop.eup %552 }
 0x236   :  { %v399_v55 = vadd.f32 %v382_v38, %v371_v53  ;;  %v348_v56 = vmul.f32 %v553_v54, %v312_v18  ;;  %v392_v3 = vpop.permute.xlu0 %391 }
 0x238   :  { %v407_v57 = vmin.f32 %v399_v55, 0.0  ;;  %v372_v58 = vmul.f32 %v359_v36, %v348_v56  ;;  %vm403_vm2 = vcmp.gt.f32.partialorder %v399_v55, 0.0 }
 0x239   :  { %v555_v59 = vpop.eup %554 }
 0x23a   :  { %v411_v60 = vmul.f32 1.442695, %v407_v57  ;;  %v400_v61 = vadd.f32 %v387_v37, %v372_v58  ;;  %v349_v62 = vmul.f32 %v555_v59, %v313_v23 }
 0x23c   :  { %558 = vpow2.f32 %v411_v60  ;;  %v408_v63 = vmin.f32 %v400_v61, 0.0  ;;  %v373_v0 = vmul.f32 %v364_v34, %v349_v62  ;;  %vm404_vm3 = vcmp.gt.f32.partialorder %v400_v61, 0.0 }
 0x23d   :  { %v557_v1 = vpop.eup %556 }
 0x23e   :  { %v413_v4 = vmul.f32 1.442695, %v408_v63  ;;  %v350_v5 = vmul.f32 %v557_v1, %v314_v27  ;;  %v401_v6 = vadd.f32 %v392_v3, %v373_v0 }
 0x240   :  { %560 = vpow2.f32 %v413_v4  ;;  %v374_v7 = vmul.f32 %v369_v35, %v350_v5  ;;  %v409_v8 = vmin.f32 %v401_v6, 0.0  ;;  %vm405_vm4 = vcmp.gt.f32.partialorder %v401_v6, 0.0 }
 0x242   :  { %v402_v10 = vadd.f32 %v397_v9, %v374_v7  ;;  %v415_v11 = vmul.f32 1.442695, %v409_v8 }
 0x244   :  { %v410_v12 = vmin.f32 %v402_v10, 0.0  ;;  %562 = vpow2.f32 %v415_v11  ;;  %vm406_vm5 = vcmp.gt.f32.partialorder %v402_v10, 0.0 }
 0x246   :  { %v559_v13 = vpop.eup %558  ;;  %v417_v14 = vmul.f32 1.442695, %v410_v12 }
 0x247   :  { %v439_v15 = vadd.f32 -1.0, %v559_v13 }
 0x248   :  { %564 = vpow2.f32 %v417_v14 }
 0x249   :  { %v423_v16 = vsel %vm403_vm2, %v399_v55, %v439_v15 }
 0x24a   :  { %v561_v17 = vpop.eup %560  ;;  %427 = vst.msk [vmem:[%s874_s5] sm:$0xff] %vm293_vm1, %v423_v16 }
 0x24b   :  { %v440_v18 = vadd.f32 -1.0, %v561_v17 }
 0x24d   :  { %v424_v19 = vsel %vm404_vm3, %v400_v61, %v440_v18 }
 0x24e   :  { %v563_v20 = vpop.eup %562  ;;  %428 = vst.msk [vmem:[%s874_s5 + $0x8] sm:$0xff] %vm293_vm1, %v424_v19 }
 0x24f   :  { %v441_v21 = vadd.f32 -1.0, %v563_v20 }
 0x251   :  { %v425_v22 = vsel %vm405_vm4, %v401_v6, %v441_v21 }
 0x252   :  { %v565_v23 = vpop.eup %564  ;;  %429 = vst.msk [vmem:[%s874_s5 + $0x10] sm:$0xff] %vm293_vm1, %v425_v22 }
 0x253   :  { %v442_v24 = vadd.f32 -1.0, %v565_v23 }
 0x255   :  { %v426_v2 = vsel %vm406_vm5, %v402_v10, %v442_v24 }
 0x256   :  { %430 = vst.msk [vmem:[%s874_s5 + $0x18] sm:$0xff] %vm293_vm1, %v426_v2 }

// kernel: actor_forward.6
= control target key start
LH: loop header
LB: loop body
LE: loop exit
PB: predicated region body
PF: predicated region fallthrough
CT: control target
= control target key end

     0   :  { %v952_v3 = vmov 0   ;;  %vm172_vm0 = vcmask 261120   ;;  %vm525_vm1 = vcmask 64512   ;;  %s1431_s1 = inlined_call_operand.vmem [shape: f32[800,8], index: 1, kind: input, shape index: {}]   ;;  %s1432_s0 = inlined_call_operand.vmem [shape: f32[32,800], index: 0, kind: input, shape index: {}]   ;;  %s1433_s2 = inlined_call_operand.vmem [shape: f32[32,1], index: 2, kind: input, shape index: {}]   ;;  %s1434_s3 = inlined_call_operand.vmem [shape: f32[32,1], index: 3, kind: input, shape index: {}]   ;;  %s1435_s4 = inlined_call_operand.vmem [shape: f32[32,1], index: 4, kind: input, shape index: {}]   ;;  %s1436_s5 = inlined_call_operand.vmem [shape: f32[32,8], index: 5, kind: output, shape index: {}]  }
   0x1   :  { %v64_v0 = vld [vmem:[%s1431_s1 + $0x80] sm:$0xff]  ;;  %v65_v1 = vld [vmem:[%s1431_s1 + $0x88] sm:$0xff]  ;;  %934 = vset.pattern.permute.xlu0 %v952_v3  ;;  %935 = vset.pattern.permute.xlu1 %v952_v3  ;;  %v66_v12 = vld [vmem:[%s1431_s1 + $0x90] sm:$0xff] }
   0x2   :  { %v48_v2 = vld [vmem:[%s1431_s1] sm:$0xff]  ;;  %v829_v4 = vpack.c.bf16 %v65_v1, %v64_v0  ;;  %v49_v5 = vld [vmem:[%s1431_s1 + $0x8] sm:$0xff]  ;;  %v67_v14 = vld [vmem:[%s1431_s1 + $0x98] sm:$0xff] }
   0x3   :  { %v96_v6 = vld [vmem:[%s1431_s1 + $0x180] sm:$0xff]  ;;  %v97_v7 = vld [vmem:[%s1431_s1 + $0x188] sm:$0xff]  ;;  %v831_v8 = vpack.c.bf16 %v49_v5, %v48_v2  ;;  %v50_v15 = vld [vmem:[%s1431_s1 + $0x10] sm:$0xff]  ;;  %v833_v17 = vpack.c.bf16 %v67_v14, %v66_v12 }
   0x4   :  { %v861_v9 = vpack.c.bf16 %v97_v7, %v96_v6  ;;  %v80_v10 = vld [vmem:[%s1431_s1 + $0x100] sm:$0xff]  ;;  %v81_v11 = vld [vmem:[%s1431_s1 + $0x108] sm:$0xff]  ;;  %830 = vmatprep.subr.bf16.mxu0 %v829_v4  ;;  %v51_v16 = vld [vmem:[%s1431_s1 + $0x18] sm:$0xff] }
   0x5   :  { %v863_v13 = vpack.c.bf16 %v81_v11, %v80_v10  ;;  %832 = vmatpush3.bf16.msra.mxu0 %v831_v8  ;;  %v835_v18 = vpack.c.bf16 %v51_v16, %v50_v15  ;;  %v98_v19 = vld [vmem:[%s1431_s1 + $0x190] sm:$0xff]  ;;  %v99_v20 = vld [vmem:[%s1431_s1 + $0x198] sm:$0xff]  ;;  %v68_v24 = vld [vmem:[%s1431_s1 + $0xa0] sm:$0xff] }
   0x6   :  { %862 = vmatprep.subr.bf16.mxu1 %v861_v9  ;;  %v82_v21 = vld [vmem:[%s1431_s1 + $0x110] sm:$0xff]  ;;  %v865_v22 = vpack.c.bf16 %v99_v20, %v98_v19  ;;  %v83_v23 = vld [vmem:[%s1431_s1 + $0x118] sm:$0xff]  ;;  %v69_v25 = vld [vmem:[%s1431_s1 + $0xa8] sm:$0xff]  ;;  %834 = vmatprep.subr.bf16.mxu0 %v833_v17 }
   0x7   :  { %864 = vmatpush3.bf16.msra.mxu1 %v863_v13  ;;  %v867_v26 = vpack.c.bf16 %v83_v23, %v82_v21  ;;  %v837_v27 = vpack.c.bf16 %v69_v25, %v68_v24  ;;  %v52_v28 = vld [vmem:[%s1431_s1 + $0x20] sm:$0xff]  ;;  %v53_v29 = vld [vmem:[%s1431_s1 + $0x28] sm:$0xff]  ;;  %v70_v36 = vld [vmem:[%s1431_s1 + $0xb0] sm:$0xff] }
   0x8   :  { %v100_v30 = vld [vmem:[%s1431_s1 + $0x1a0] sm:$0xff]  ;;  %866 = vmatprep.subr.bf16.mxu1 %v865_v22  ;;  %v101_v31 = vld [vmem:[%s1431_s1 + $0x1a8] sm:$0xff]  ;;  %v839_v34 = vpack.c.bf16 %v53_v29, %v52_v28  ;;  %v71_v37 = vld [vmem:[%s1431_s1 + $0xb8] sm:$0xff] }
   0x9   :  { %v84_v32 = vld [vmem:[%s1431_s1 + $0x120] sm:$0xff]  ;;  %v85_v33 = vld [vmem:[%s1431_s1 + $0x128] sm:$0xff]  ;;  %836 = vmatpush3.bf16.msra.mxu0 %v835_v18  ;;  %v869_v35 = vpack.c.bf16 %v101_v31, %v100_v30  ;;  %v54_v38 = vld [vmem:[%s1431_s1 + $0x30] sm:$0xff]  ;;  %v841_v40 = vpack.c.bf16 %v71_v37, %v70_v36 }
   0xa   :  { %838 = vmatprep.subr.bf16.mxu0 %v837_v27  ;;  %v871_v39 = vpack.c.bf16 %v85_v33, %v84_v32  ;;  %v55_v41 = vld [vmem:[%s1431_s1 + $0x38] sm:$0xff]  ;;  %v102_v42 = vld [vmem:[%s1431_s1 + $0x1b0] sm:$0xff]  ;;  %v72_v47 = vld [vmem:[%s1431_s1 + $0xc0] sm:$0xff] }
   0xb   :  { %868 = vmatpush3.bf16.msra.mxu1 %v867_v26  ;;  %v103_v43 = vld [vmem:[%s1431_s1 + $0x1b8] sm:$0xff]  ;;  %v86_v45 = vld [vmem:[%s1431_s1 + $0x130] sm:$0xff]  ;;  %v73_v48 = vld [vmem:[%s1431_s1 + $0xc8] sm:$0xff]  ;;  %v843_v49 = vpack.c.bf16 %v55_v41, %v54_v38 }
   0xc   :  { %870 = vmatprep.subr.bf16.mxu1 %v869_v35  ;;  %v873_v44 = vpack.c.bf16 %v103_v43, %v102_v42  ;;  %v87_v46 = vld [vmem:[%s1431_s1 + $0x138] sm:$0xff]  ;;  %v104_v50 = vld [vmem:[%s1431_s1 + $0x1c0] sm:$0xff]  ;;  %v105_v51 = vld [vmem:[%s1431_s1 + $0x1c8] sm:$0xff]  ;;  %v845_v53 = vpack.c.bf16 %v73_v48, %v72_v47 }
   0xd   :  { %840 = vmatpush3.bf16.msra.mxu0 %v839_v34  ;;  %v875_v52 = vpack.c.bf16 %v87_v46, %v86_v45  ;;  %v56_v54 = vld [vmem:[%s1431_s1 + $0x40] sm:$0xff]  ;;  %v57_v55 = vld [vmem:[%s1431_s1 + $0x48] sm:$0xff]  ;;  %v877_v57 = vpack.c.bf16 %v105_v51, %v104_v50  ;;  %v74_v59 = vld [vmem:[%s1431_s1 + $0xd0] sm:$0xff] }
   0xe   :  { %842 = vmatprep.subr.bf16.mxu0 %v841_v40  ;;  %v88_v56 = vld [vmem:[%s1431_s1 + $0x140] sm:$0xff]  ;;  %v89_v58 = vld [vmem:[%s1431_s1 + $0x148] sm:$0xff]  ;;  %v75_v60 = vld [vmem:[%s1431_s1 + $0xd8] sm:$0xff]  ;;  %v847_v63 = vpack.c.bf16 %v57_v55, %v56_v54 }
   0xf   :  { %872 = vmatpush3.bf16.msra.mxu1 %v871_v39  ;;  %v106_v61 = vld [vmem:[%s1431_s1 + $0x1d0] sm:$0xff]  ;;  %v107_v62 = vld [vmem:[%s1431_s1 + $0x1d8] sm:$0xff]  ;;  %v879_v0 = vpack.c.bf16 %v89_v58, %v88_v56  ;;  %v849_v1 = vpack.c.bf16 %v75_v60, %v74_v59  ;;  %v76_v7 = vld [vmem:[%s1431_s1 + $0xe0] sm:$0xff] }
  0x10   :  { %874 = vmatprep.subr.bf16.mxu1 %v873_v44  ;;  %v58_v2 = vld [vmem:[%s1431_s1 + $0x50] sm:$0xff]  ;;  %v59_v3 = vld [vmem:[%s1431_s1 + $0x58] sm:$0xff]  ;;  %v881_v5 = vpack.c.bf16 %v107_v62, %v106_v61  ;;  %v77_v8 = vld [vmem:[%s1431_s1 + $0xe8] sm:$0xff] }
  0x11   :  { %844 = vmatpush3.bf16.msra.mxu0 %v843_v49  ;;  %v90_v4 = vld [vmem:[%s1431_s1 + $0x150] sm:$0xff]  ;;  %v91_v6 = vld [vmem:[%s1431_s1 + $0x158] sm:$0xff]  ;;  %v108_v9 = vld [vmem:[%s1431_s1 + $0x1e0] sm:$0xff]  ;;  %v851_v11 = vpack.c.bf16 %v59_v3, %v58_v2  ;;  %v853_v15 = vpack.c.bf16 %v77_v8, %v76_v7 }
  0x12   :  { %846 = vmatprep.subr.bf16.mxu0 %v845_v53  ;;  %v109_v10 = vld [vmem:[%s1431_s1 + $0x1e8] sm:$0xff]  ;;  %v60_v12 = vld [vmem:[%s1431_s1 + $0x60] sm:$0xff]  ;;  %v883_v14 = vpack.c.bf16 %v91_v6, %v90_v4  ;;  %v78_v20 = vld [vmem:[%s1431_s1 + $0xf0] sm:$0xff] }
  0x13   :  { %876 = vmatpush3.bf16.msra.mxu1 %v875_v52  ;;  %v21_v13 = vld [vmem:[%s1432_s0 + $0x8] sm:$0xff]  ;;  %v92_v17 = vld [vmem:[%s1431_s1 + $0x160] sm:$0xff]  ;;  %v885_v19 = vpack.c.bf16 %v109_v10, %v108_v9  ;;  %v79_v21 = vld [vmem:[%s1431_s1 + $0xf8] sm:$0xff] }
  0x14   :  { %878 = vmatprep.subr.bf16.mxu1 %v877_v57  ;;  %v61_v16 = vld [vmem:[%s1431_s1 + $0x68] sm:$0xff]  ;;  %249 = vmatprep.mubr.f32.mxu0 %v21_v13  ;;  %v23_v22 = vld [vmem:[%s1432_s0 + $0x18] sm:$0xff]  ;;  %v110_v23 = vld [vmem:[%s1431_s1 + $0x1f0] sm:$0xff]  ;;  %v857_v27 = vpack.c.bf16 %v79_v21, %v78_v20 }
  0x15   :  { %848 = vmatpush3.bf16.msra.mxu0 %v847_v63  ;;  %v93_v18 = vld [vmem:[%s1431_s1 + $0x168] sm:$0xff]  ;;  %v111_v24 = vld [vmem:[%s1431_s1 + $0x1f8] sm:$0xff]  ;;  %334 = vmatprep.mubr.f32.mxu1 %v23_v22  ;;  %v855_v25 = vpack.c.bf16 %v61_v16, %v60_v12  ;;  %v62_v28 = vld [vmem:[%s1431_s1 + $0x70] sm:$0xff] }
  0x16   :  { %850 = vmatprep.subr.bf16.mxu0 %v849_v1  ;;  %v887_v26 = vpack.c.bf16 %v93_v18, %v92_v17  ;;  %v63_v29 = vld [vmem:[%s1431_s1 + $0x78] sm:$0xff]  ;;  %v94_v30 = vld [vmem:[%s1431_s1 + $0x170] sm:$0xff]  ;;  %v889_v31 = vpack.c.bf16 %v111_v24, %v110_v23  ;;  %v128_v33 = vld [vmem:[%s1431_s1 + $0x280] sm:$0xff] }
  0x17   :  { %880 = vmatpush3.bf16.msra.mxu1 %v879_v0  ;;  %v95_v32 = vld [vmem:[%s1431_s1 + $0x178] sm:$0xff]  ;;  %v129_v34 = vld [vmem:[%s1431_s1 + $0x288] sm:$0xff]  ;;  %v859_v35 = vpack.c.bf16 %v63_v29, %v62_v28  ;;  %v112_v38 = vld [vmem:[%s1431_s1 + $0x200] sm:$0xff] }
  0x18   :  { %882 = vmatprep.subr.bf16.mxu1 %v881_v5  ;;  %v891_v36 = vpack.c.bf16 %v95_v32, %v94_v30  ;;  %v893_v37 = vpack.c.bf16 %v129_v34, %v128_v33  ;;  %v113_v39 = vld [vmem:[%s1431_s1 + $0x208] sm:$0xff]  ;;  %v130_v40 = vld [vmem:[%s1431_s1 + $0x290] sm:$0xff]  ;;  %v131_v41 = vld [vmem:[%s1431_s1 + $0x298] sm:$0xff] }
  0x19   :  { %852 = vmatpush3.bf16.msra.mxu0 %v851_v11  ;;  %v20_v42 = vld [vmem:[%s1432_s0] sm:$0xff]  ;;  %v895_v43 = vpack.c.bf16 %v113_v39, %v112_v38  ;;  %v22_v44 = vld [vmem:[%s1432_s0 + $0x10] sm:$0xff]  ;;  %v897_v46 = vpack.c.bf16 %v131_v41, %v130_v40  ;;  %v115_v48 = vld [vmem:[%s1431_s1 + $0x218] sm:$0xff] }
  0x1a   :  { %854 = vmatprep.subr.bf16.mxu0 %v853_v15  ;;  %v144_v45 = vld [vmem:[%s1431_s1 + $0x300] sm:$0xff]  ;;  %v114_v47 = vld [vmem:[%s1431_s1 + $0x210] sm:$0xff]  ;;  %v145_v49 = vld [vmem:[%s1431_s1 + $0x308] sm:$0xff] }
  0x1b   :  { %884 = vmatpush3.bf16.msra.mxu1 %v883_v14  ;;  %v132_v50 = vld [vmem:[%s1431_s1 + $0x2a0] sm:$0xff]  ;;  %v133_v51 = vld [vmem:[%s1431_s1 + $0x2a8] sm:$0xff]  ;;  %v925_v53 = vpack.c.bf16 %v145_v49, %v144_v45  ;;  %v30_v54 = vld [vmem:[%s1432_s0 + $0x50] sm:$0xff]  ;;  %v899_v55 = vpack.c.bf16 %v115_v48, %v114_v47 }
  0x1c   :  { %886 = vmatprep.subr.bf16.mxu1 %v885_v19  ;;  %v28_v52 = vld [vmem:[%s1432_s0 + $0x40] sm:$0xff]  ;;  %v117_v57 = vld [vmem:[%s1431_s1 + $0x228] sm:$0xff]  ;;  %v27_v58 = vld [vmem:[%s1432_s0 + $0x38] sm:$0xff]  ;;  %v901_v59 = vpack.c.bf16 %v133_v51, %v132_v50 }
  0x1d   :  { %856 = vmatpush3.bf16.msra.mxu0 %v855_v25  ;;  %v116_v56 = vld [vmem:[%s1431_s1 + $0x220] sm:$0xff]  ;;  %v134_v60 = vld [vmem:[%s1431_s1 + $0x2b0] sm:$0xff]  ;;  %v135_v61 = vld [vmem:[%s1431_s1 + $0x2b8] sm:$0xff] }
  0x1e   :  { %858 = vmatprep.subr.bf16.mxu0 %v857_v27  ;;  %v29_v62 = vld [vmem:[%s1432_s0 + $0x48] sm:$0xff]  ;;  %v35_v63 = vld [vmem:[%s1432_s0 + $0x78] sm:$0xff]  ;;  %v146_v0 = vld [vmem:[%s1431_s1 + $0x310] sm:$0xff]  ;;  %v903_v4 = vpack.c.bf16 %v117_v57, %v116_v56  ;;  %v905_v6 = vpack.c.bf16 %v135_v61, %v134_v60 }
  0x1f   :  { %888 = vmatpush3.bf16.msra.mxu1 %v887_v26  ;;  %v147_v1 = vld [vmem:[%s1431_s1 + $0x318] sm:$0xff]  ;;  %v37_v2 = vld [vmem:[%s1432_s0 + $0x88] sm:$0xff]  ;;  %v34_v5 = vld [vmem:[%s1432_s0 + $0x70] sm:$0xff] }
  0x20   :  { %890 = vmatprep.subr.bf16.mxu1 %v889_v31  ;;  %v929_v3 = vpack.c.bf16 %v147_v1, %v146_v0  ;;  %v118_v7 = vld [vmem:[%s1431_s1 + $0x230] sm:$0xff]  ;;  %v119_v8 = vld [vmem:[%s1431_s1 + $0x238] sm:$0xff]  ;;  %v36_v9 = vld [vmem:[%s1432_s0 + $0x80] sm:$0xff] }
  0x21   :  { %860 = vmatpush3.bf16.msra.mxu0 %v859_v35  ;;  %v136_v10 = vld [vmem:[%s1431_s1 + $0x2c0] sm:$0xff]  ;;  %v137_v11 = vld [vmem:[%s1431_s1 + $0x2c8] sm:$0xff]  ;;  %v42_v12 = vld [vmem:[%s1432_s0 + $0xb0] sm:$0xff]  ;;  %v907_v15 = vpack.c.bf16 %v119_v8, %v118_v7 }
  0x22   :  { %894 = vmatprep.subr.bf16.mxu0 %v893_v37  ;;  %v44_v13 = vld [vmem:[%s1432_s0 + $0xc0] sm:$0xff]  ;;  %v41_v16 = vld [vmem:[%s1432_s0 + $0xa8] sm:$0xff]  ;;  %v150_v17 = vld [vmem:[%s1433_s2 + $0x10] sm:$0xff]  ;;  %v909_v18 = vpack.c.bf16 %v137_v11, %v136_v10 }
  0x23   :  { %892 = vmatpush3.bf16.msra.mxu1 %v891_v36  ;;  %v148_v14 = vld [vmem:[%s1433_s2] sm:$0xff]  ;;  %v121_v20 = vld [vmem:[%s1431_s1 + $0x248] sm:$0xff]  ;;  %v43_v21 = vld [vmem:[%s1432_s0 + $0xb8] sm:$0xff]  ;;  %164 = vperm.xlu1 %935, %v150_v17  }
  0x24   :  { %250 = vmatmul.mubr.f32.vlgmr.msra.gmra.mrb[0].mxu0 %v20_v42  ;;  %926 = vmatprep.subr.bf16.mxu1 %v925_v53  ;;  %v120_v19 = vld [vmem:[%s1431_s1 + $0x240] sm:$0xff]  ;;  %v138_v22 = vld [vmem:[%s1431_s1 + $0x2d0] sm:$0xff]  ;;  %v139_v23 = vld [vmem:[%s1431_s1 + $0x2d8] sm:$0xff] }
  0x25   :  { %896 = vmatpush3.bf16.msra.mxu0 %v895_v43  ;;  %254 = vmatprep.mubr.f32.mxu0 %v28_v52  ;;  %v25_v24 = vld [vmem:[%s1432_s0 + $0x28] sm:$0xff]  ;;  %v26_v25 = vld [vmem:[%s1432_s0 + $0x30] sm:$0xff]  ;;  %v911_v27 = vpack.c.bf16 %v121_v20, %v120_v19  ;;  %v151_v28 = vld [vmem:[%s1433_s2 + $0x18] sm:$0xff]  ;;  %v913_v29 = vpack.c.bf16 %v139_v23, %v138_v22 }
  0x26   :  { %335 = vmatmul.mubr.f32.vlgmr.msra.gmra.mrb[0].mxu1 %v22_v44  ;;  %898 = vmatprep.subr.bf16.mxu0 %v897_v46  ;;  %v149_v26 = vld [vmem:[%s1433_s2 + $0x8] sm:$0xff]  ;;  %v122_v30 = vld [vmem:[%s1431_s1 + $0x250] sm:$0xff]  ;;  %v123_v31 = vld [vmem:[%s1431_s1 + $0x258] sm:$0xff] }
  0x27   :  { %339 = vmatprep.mubr.f32.mxu1 %v30_v54  ;;  %928 = vmatpush3.bf16.msra.mxu1 %v925_v53  ;;  %v33_v32 = vld [vmem:[%s1432_s0 + $0x68] sm:$0xff]  ;;  %v140_v33 = vld [vmem:[%s1431_s1 + $0x2e0] sm:$0xff]  ;;  %v915_v36 = vpack.c.bf16 %v123_v31, %v122_v30  ;;  %v47_v40 = vld [vmem:[%s1432_s0 + $0xd8] sm:$0xff] }
  0x28   :  { %255 = vmatmul.mubr.f32.gmra.mrb[2].mxu0 %v27_v58  ;;  %930 = vmatprep.subr.bf16.mxu1 %v929_v3  ;;  %v141_v34 = vld [vmem:[%s1431_s1 + $0x2e8] sm:$0xff]  ;;  %v40_v35 = vld [vmem:[%s1432_s0 + $0xa0] sm:$0xff]  ;;  %v142_v41 = vld [vmem:[%s1431_s1 + $0x2f0] sm:$0xff] }
  0x29   :  { %900 = vmatpush3.bf16.msra.mxu0 %v899_v55  ;;  %259 = vmatprep.mubr.f32.mxu0 %v35_v63  ;;  %v917_v37 = vpack.c.bf16 %v141_v34, %v140_v33  ;;  %v124_v38 = vld [vmem:[%s1431_s1 + $0x260] sm:$0xff]  ;;  %v125_v39 = vld [vmem:[%s1431_s1 + $0x268] sm:$0xff]  ;;  %v143_v42 = vld [vmem:[%s1431_s1 + $0x2f8] sm:$0xff] }
  0x2a   :  { %340 = vmatmul.mubr.f32.gmra.mrb[2].mxu1 %v29_v62  ;;  %902 = vmatprep.subr.bf16.mxu0 %v901_v59  ;;  %v919_v43 = vpack.c.bf16 %v125_v39, %v124_v38  ;;  %v921_v44 = vpack.c.bf16 %v143_v42, %v142_v41  ;;  %v126_v45 = vld [vmem:[%s1431_s1 + $0x270] sm:$0xff]  ;;  %v127_v46 = vld [vmem:[%s1431_s1 + $0x278] sm:$0xff]  ;;  %v24_v48 = vld [vmem:[%s1432_s0 + $0x20] sm:$0xff] }
  0x2b   :  { %344 = vmatprep.mubr.f32.mxu1 %v37_v2  ;;  %932 = vmatpush3.bf16.msra.mxu1 %v929_v3  ;;  %v923_v47 = vpack.c.bf16 %v127_v46, %v126_v45  ;;  %v32_v49 = vld [vmem:[%s1432_s0 + $0x60] sm:$0xff]  ;;  %v31_v50 = vld [vmem:[%s1432_s0 + $0x58] sm:$0xff]  ;;  %v38_v52 = vld [vmem:[%s1432_s0 + $0x90] sm:$0xff] }
  0x2c   :  { %260 = vmatmul.mubr.f32.gmra.mrb[4].mxu0 %v34_v5  ;;  %154 = vperm.xlu0 %934, %v148_v14   ;;  %v39_v51 = vld [vmem:[%s1432_s0 + $0x98] sm:$0xff]  ;;  %v46_v53 = vld [vmem:[%s1432_s0 + $0xd0] sm:$0xff]  ;;  %v45_v54 = vld [vmem:[%s1432_s0 + $0xc8] sm:$0xff] }
  0x2d   :  { %904 = vmatpush3.bf16.msra.mxu0 %v903_v4  ;;  %264 = vmatprep.mubr.f32.mxu0 %v42_v12 }
  0x2e   :  { %345 = vmatmul.mubr.f32.gmra.mrb[4].mxu1 %v36_v9  ;;  %906 = vmatprep.subr.bf16.mxu0 %v905_v6 }
  0x2f   :  { %349 = vmatprep.mubr.f32.mxu1 %v44_v13  ;;  %169 = vperm.xlu1 %935, %v151_v28  }
  0x30   :  { %265 = vmatmul.mubr.f32.gmra.mrb[6].mxu0 %v41_v16  ;;  %159 = vperm.xlu0 %934, %v149_v26  }
  0x31   :  { %908 = vmatpush3.bf16.msra.mxu0 %v907_v15  ;;  %419 = vmatprep.mubr.f32.mxu0 %v25_v24 }
  0x32   :  { %350 = vmatmul.mubr.f32.gmra.mrb[6].mxu1 %v43_v21  ;;  %910 = vmatprep.subr.bf16.mxu0 %v909_v18 }
  0x33   :  { %823 = vmatprep.mubr.msk.f32.mxu1 %vm172_vm0, %v26_v25 }
  0x35   :  { %912 = vmatpush3.bf16.msra.mxu0 %v911_v27 }
  0x36   :  { %824 = vmatmul.mubr.msk.f32.vlgmr.msra.gmra.mrb[8].mxu1 %vm172_vm0, %v33_v32  ;;  %914 = vmatprep.subr.bf16.mxu0 %v913_v29 }
  0x37   :  { %826 = vmatprep.mubr.msk.f32.mxu1 %vm172_vm0, %v40_v35 }
  0x39   :  { %916 = vmatpush3.bf16.msra.mxu0 %v915_v36 }
  0x3a   :  { %827 = vmatmul.mubr.msk.f32.gmra.mrb[10].mxu1 %vm172_vm0, %v47_v40  ;;  %918 = vmatprep.subr.bf16.mxu0 %v917_v37 }
  0x3d   :  { %920 = vmatpush3.bf16.msra.mxu0 %v919_v43 }
  0x3e   :  { %922 = vmatprep.subr.bf16.mxu0 %v921_v44 }
  0x41   :  { %924 = vmatpush3.bf16.msra.mxu0 %v923_v47 }
  0x44   :  { %420 = vmatmul.mubr.f32.vlgmr.msra.gmra.mrb[8].mxu0 %v24_v48 }
  0x45   :  { %424 = vmatprep.mubr.f32.mxu0 %v32_v49 }
  0x48   :  { %425 = vmatmul.mubr.f32.gmra.mrb[10].mxu0 %v31_v50 }
  0x49   :  { %429 = vmatprep.mubr.f32.mxu0 %v39_v51 }
  0x4c   :  { %430 = vmatmul.mubr.f32.gmra.mrb[12].mxu0 %v38_v52 }
  0x4d   :  { %434 = vmatprep.mubr.f32.mxu0 %v46_v53 }
  0x50   :  { %435 = vmatmul.mubr.f32.gmra.mrb[14].mxu0 %v45_v54 }
  0xa2   :  { %v165_v6 = vpop.permute.xlu1 %164 }
  0xab   :  { %v155_v56 = vpop.permute.xlu0 %154 }
  0xae   :  { %v170_v18 = vpop.permute.xlu1 %169 }
  0xaf   :  { %v160_v0 = vpop.permute.xlu0 %159 }
  0xf7   :  { %v707_v55 = vpop.f32.mrb[0].mxu0 }
  0xf8   :  { %v708_v57 = vpop.f32.mrb[1].mxu0 }
  0xf9   :  { %v751_v58 = vpop.f32.mrb[0].mxu1  ;;  %v709_v59 = vadd.f32 %v708_v57, %v707_v55  ;;  %v567_v55 = vld [vmem:[%s1434_s3] sm:$0xff]  ;;  %v570_v57 = vld [vmem:[%s1434_s3 + $0x18] sm:$0xff] }
  0xfa   :  { %v752_v60 = vpop.f32.mrb[1].mxu1 }
  0xfb   :  { %v753_v61 = vadd.f32 %v752_v60, %v751_v58  ;;  %v252_v62 = vadd.f32 %v709_v59, %v155_v56  ;;  %v710_v63 = vpop.f32.mrb[2].mxu0  ;;  %v569_v56 = vld [vmem:[%s1434_s3 + $0x10] sm:$0xff]  ;;  %v608_v58 = vld [vmem:[%s1435_s4 + $0x8] sm:$0xff]  ;;  %v607_v60 = vld [vmem:[%s1435_s4] sm:$0xff] }
  0xfc   :  { %v711_v1 = vpop.f32.mrb[3].mxu0  ;;  %v568_v59 = vld [vmem:[%s1434_s3 + $0x8] sm:$0xff] }
  0xfd   :  { %v754_v2 = vpop.f32.mrb[2].mxu1  ;;  %v337_v3 = vadd.f32 %v753_v61, %v252_v62  ;;  %v712_v4 = vadd.f32 %v711_v1, %v710_v63 }
  0xfe   :  { %v755_v5 = vpop.f32.mrb[3].mxu1 }
  0xff   :  { %v756_v7 = vadd.f32 %v755_v5, %v754_v2  ;;  %v257_v8 = vadd.f32 %v712_v4, %v160_v0  ;;  %v713_v9 = vpop.f32.mrb[4].mxu0 }
 0x100   :  { %v714_v10 = vpop.f32.mrb[5].mxu0 }
 0x101   :  { %v757_v11 = vpop.f32.mrb[4].mxu1  ;;  %v342_v12 = vadd.f32 %v756_v7, %v257_v8  ;;  %v715_v13 = vadd.f32 %v714_v10, %v713_v9 }
 0x102   :  { %v758_v14 = vpop.f32.mrb[5].mxu1 }
 0x103   :  { %v759_v15 = vadd.f32 %v758_v14, %v757_v11  ;;  %v262_v16 = vadd.f32 %v715_v13, %v165_v6  ;;  %v716_v17 = vpop.f32.mrb[6].mxu0 }
 0x104   :  { %v717_v19 = vpop.f32.mrb[7].mxu0 }
 0x105   :  { %v760_v20 = vpop.f32.mrb[6].mxu1  ;;  %v347_v21 = vadd.f32 %v759_v15, %v262_v16  ;;  %v718_v22 = vadd.f32 %v717_v19, %v716_v17  ;;  %v610_v17 = vld [vmem:[%s1435_s4 + $0x18] sm:$0xff] }
 0x106   :  { %v761_v23 = vpop.f32.mrb[7].mxu1 }
 0x107   :  { %v762_v24 = vadd.f32 %v761_v23, %v760_v20  ;;  %v267_v25 = vadd.f32 %v718_v22, %v170_v18  ;;  %v609_v18 = vld [vmem:[%s1435_s4 + $0x10] sm:$0xff] }
 0x109   :  { %v825_v26 = vpop.f32.mrb[8].mxu1  ;;  %v352_v27 = vadd.f32 %v762_v24, %v267_v25 }
 0x10a   :  { %v506_v28 = vpop.f32.mrb[9].mxu1 }
 0x10d   :  { %v828_v29 = vpop.f32.mrb[10].mxu1 }
 0x10e   :  { %v516_v30 = vpop.f32.mrb[11].mxu1 }
 0x117   :  { %v795_v31 = vpop.f32.mrb[8].mxu0 }
 0x118   :  { %v796_v32 = vpop.f32.mrb[9].mxu0 }
 0x119   :  { %v797_v33 = vadd.f32 %v796_v32, %v795_v31 }
 0x11b   :  { %v798_v34 = vpop.f32.mrb[10].mxu0  ;;  %v422_v35 = vadd.f32 %v797_v33, %v337_v3 }
 0x11c   :  { %v799_v36 = vpop.f32.mrb[11].mxu0 }
 0x11d   :  { %v800_v37 = vadd.f32 %v799_v36, %v798_v34  ;;  %v507_v38 = vadd.f32 %v506_v28, %v422_v35 }
 0x11f   :  { %v427_v39 = vadd.f32 %v800_v37, %v342_v12  ;;  %v801_v40 = vpop.f32.mrb[12].mxu0  ;;  %v526_v41 = vsel %vm525_vm1, %v507_v38, 0.0 }
 0x120   :  { %v802_v42 = vpop.f32.mrb[13].mxu0  ;;  %527 = vadd.xlane.f32.xlu0 %v526_v41 }
 0x121   :  { %v803_v43 = vadd.f32 %v802_v42, %v801_v40  ;;  %v512_v44 = vadd.f32 %v825_v26, %v427_v39 }
 0x123   :  { %v804_v45 = vpop.f32.mrb[14].mxu0  ;;  %v432_v46 = vadd.f32 %v803_v43, %v347_v21  ;;  %v529_v47 = vsel %vm525_vm1, %v512_v44, 0.0 }
 0x124   :  { %v805_v48 = vpop.f32.mrb[15].mxu0  ;;  %530 = vadd.xlane.f32.xlu1 %v529_v47 }
 0x125   :  { %v517_v49 = vadd.f32 %v516_v30, %v432_v46  ;;  %v806_v50 = vadd.f32 %v805_v48, %v804_v45 }
 0x127   :  { %v437_v51 = vadd.f32 %v806_v50, %v352_v27  ;;  %v532_v52 = vsel %vm525_vm1, %v517_v49, 0.0 }
 0x128   :  { %533 = vadd.xlane.f32.xlu0 %v532_v52 }
 0x129   :  { %v522_v53 = vadd.f32 %v828_v29, %v437_v51 }
 0x12b   :  { %v535_v54 = vsel %vm525_vm1, %v522_v53, 0.0 }
 0x12c   :  { %536 = vadd.xlane.f32.xlu0 %v535_v54 }
 0x135   :  { %585 = vperm.xlu1 %935, %v567_v55  }
 0x139   :  { %595 = vperm.xlu1 %935, %v569_v56  }
 0x13d   :  { %600 = vperm.xlu1 %935, %v570_v57  }
 0x141   :  { %618 = vperm.xlu1 %935, %v608_v58  }
 0x142   :  { %590 = vperm.xlu0 %934, %v568_v59  }
 0x146   :  { %613 = vperm.xlu0 %934, %v607_v60  }
 0x1ad   :  { %v528_v61 = vpop.xlane.xlu0 %527 }
 0x1ae   :  { %v539_v62 = vmul.f32 0.125, %v528_v61 }
 0x1b0   :  { %v543_v63 = vsub.f32 %v507_v38, %v539_v62 }
 0x1b1   :  { %v531_v0 = vpop.xlane.xlu1 %530 }
 0x1b2   :  { %v540_v1 = vmul.f32 0.125, %v531_v0  ;;  %v547_v2 = vmul.f32 %v543_v63, %v543_v63 }
 0x1b4   :  { %v544_v3 = vsub.f32 %v512_v44, %v540_v1  ;;  %v551_v4 = vsel %vm525_vm1, %v547_v2, 0.0 }
 0x1b5   :  { %552 = vadd.xlane.f32.xlu1 %v551_v4  ;;  %v534_v5 = vpop.xlane.xlu0 %533  ;;  %v586_v19 = vpop.permute.xlu1 %585 }
 0x1b6   :  { %v541_v6 = vmul.f32 0.125, %v534_v5  ;;  %v548_v7 = vmul.f32 %v544_v3, %v544_v3 }
 0x1b8   :  { %v545_v8 = vsub.f32 %v517_v49, %v541_v6  ;;  %v554_v9 = vsel %vm525_vm1, %v548_v7, 0.0 }
 0x1b9   :  { %555 = vadd.xlane.f32.xlu0 %v554_v9  ;;  %v537_v10 = vpop.xlane.xlu0 %536  ;;  %v596_v20 = vpop.permute.xlu1 %595 }
 0x1ba   :  { %v542_v11 = vmul.f32 0.125, %v537_v10  ;;  %v549_v12 = vmul.f32 %v545_v8, %v545_v8 }
 0x1bc   :  { %v546_v13 = vsub.f32 %v522_v53, %v542_v11  ;;  %v557_v14 = vsel %vm525_vm1, %v549_v12, 0.0 }
 0x1bd   :  { %558 = vadd.xlane.f32.xlu1 %v557_v14  ;;  %v601_v21 = vpop.permute.xlu1 %600 }
 0x1be   :  { %v550_v15 = vmul.f32 %v546_v13, %v546_v13 }
 0x1c0   :  { %v560_v16 = vsel %vm525_vm1, %v550_v15, 0.0 }
 0x1c1   :  { %561 = vadd.xlane.f32.xlu0 %v560_v16  ;;  %v591_v22 = vpop.permute.xlu0 %590  ;;  %v619_v23 = vpop.permute.xlu1 %618 }
 0x1c5   :  { %v614_v24 = vpop.permute.xlu0 %613 }
 0x1ce   :  { %628 = vperm.xlu1 %935, %v610_v17  }
 0x1d7   :  { %623 = vperm.xlu0 %934, %v609_v18  }
 0x242   :  { %v553_v25 = vpop.xlane.xlu1 %552 }
 0x243   :  { %v563_v26 = vmul.f32 0.125, %v553_v25 }
 0x245   :  { %v571_v27 = vadd.f32 1e-05, %v563_v26 }
 0x246   :  { %v556_v28 = vpop.xlane.xlu0 %555 }
 0x247   :  { %936 = vrsqrt.f32 %v571_v27  ;;  %v564_v29 = vmul.f32 0.125, %v556_v28 }
 0x249   :  { %v572_v30 = vadd.f32 1e-05, %v564_v29 }
 0x24a   :  { %v559_v31 = vpop.xlane.xlu1 %558 }
 0x24b   :  { %938 = vrsqrt.f32 %v572_v30  ;;  %v565_v32 = vmul.f32 0.125, %v559_v31 }
 0x24d   :  { %v573_v33 = vadd.f32 1e-05, %v565_v32 }
 0x24e   :  { %v562_v34 = vpop.xlane.xlu0 %561  ;;  %v629_v58 = vpop.permute.xlu1 %628 }
 0x24f   :  { %940 = vrsqrt.f32 %v573_v33  ;;  %v566_v35 = vmul.f32 0.125, %v562_v34 }
 0x251   :  { %v937_v36 = vpop.eup %936  ;;  %v574_v37 = vadd.f32 1e-05, %v566_v35 }
 0x252   :  { %v579_v38 = vmul.f32 %v937_v36, %v543_v63 }
 0x253   :  { %942 = vrsqrt.f32 %v574_v37 }
 0x254   :  { %v603_v39 = vmul.f32 %v586_v19, %v579_v38 }
 0x255   :  { %v939_v40 = vpop.eup %938 }
 0x256   :  { %v631_v41 = vadd.f32 %v614_v24, %v603_v39  ;;  %v580_v42 = vmul.f32 %v939_v40, %v544_v3  ;;  %v624_v52 = vpop.permute.xlu0 %623 }
 0x258   :  { %v639_v43 = vmin.f32 %v631_v41, 0.0  ;;  %v604_v44 = vmul.f32 %v591_v22, %v580_v42  ;;  %vm635_vm2 = vcmp.gt.f32.partialorder %v631_v41, 0.0 }
 0x259   :  { %v941_v45 = vpop.eup %940 }
 0x25a   :  { %v643_v46 = vmul.f32 1.442695, %v639_v43  ;;  %v632_v47 = vadd.f32 %v619_v23, %v604_v44  ;;  %v581_v48 = vmul.f32 %v941_v45, %v545_v8 }
 0x25c   :  { %944 = vpow2.f32 %v643_v46  ;;  %v640_v49 = vmin.f32 %v632_v47, 0.0  ;;  %v605_v50 = vmul.f32 %v596_v20, %v581_v48  ;;  %vm636_vm3 = vcmp.gt.f32.partialorder %v632_v47, 0.0 }
 0x25d   :  { %v943_v51 = vpop.eup %942 }
 0x25e   :  { %v645_v53 = vmul.f32 1.442695, %v640_v49  ;;  %v582_v54 = vmul.f32 %v943_v51, %v546_v13  ;;  %v633_v55 = vadd.f32 %v624_v52, %v605_v50 }
 0x260   :  { %946 = vpow2.f32 %v645_v53  ;;  %v606_v56 = vmul.f32 %v601_v21, %v582_v54  ;;  %v641_v57 = vmin.f32 %v633_v55, 0.0  ;;  %vm637_vm4 = vcmp.gt.f32.partialorder %v633_v55, 0.0 }
 0x262   :  { %v634_v59 = vadd.f32 %v629_v58, %v606_v56  ;;  %v647_v60 = vmul.f32 1.442695, %v641_v57 }
 0x264   :  { %v642_v61 = vmin.f32 %v634_v59, 0.0  ;;  %948 = vpow2.f32 %v647_v60  ;;  %vm638_vm5 = vcmp.gt.f32.partialorder %v634_v59, 0.0 }
 0x266   :  { %v945_v62 = vpop.eup %944  ;;  %v649_v63 = vmul.f32 1.442695, %v642_v61 }
 0x267   :  { %v671_v0 = vadd.f32 -1.0, %v945_v62 }
 0x268   :  { %950 = vpow2.f32 %v649_v63 }
 0x269   :  { %v655_v1 = vsel %vm635_vm2, %v631_v41, %v671_v0 }
 0x26a   :  { %v947_v2 = vpop.eup %946  ;;  %659 = vst.msk [vmem:[%s1436_s5] sm:$0xff] %vm525_vm1, %v655_v1 }
 0x26b   :  { %v672_v3 = vadd.f32 -1.0, %v947_v2 }
 0x26d   :  { %v656_v4 = vsel %vm636_vm3, %v632_v47, %v672_v3 }
 0x26e   :  { %v949_v5 = vpop.eup %948  ;;  %660 = vst.msk [vmem:[%s1436_s5 + $0x8] sm:$0xff] %vm525_vm1, %v656_v4 }
 0x26f   :  { %v673_v6 = vadd.f32 -1.0, %v949_v5 }
 0x271   :  { %v657_v7 = vsel %vm637_vm4, %v633_v55, %v673_v6 }
 0x272   :  { %v951_v8 = vpop.eup %950  ;;  %661 = vst.msk [vmem:[%s1436_s5 + $0x10] sm:$0xff] %vm525_vm1, %v657_v7 }
 0x273   :  { %v674_v9 = vadd.f32 -1.0, %v951_v8 }
 0x275   :  { %v658_v10 = vsel %vm638_vm5, %v634_v59, %v674_v9 }
 0x276   :  { %662 = vst.msk [vmem:[%s1436_s5 + $0x18] sm:$0xff] %vm525_vm1, %v658_v10 }

// kernel: actor_forward.7
= control target key start
LH: loop header
LB: loop body
LE: loop exit
PB: predicated region body
PF: predicated region fallthrough
CT: control target
= control target key end

     0   :  { %vm48_vm0 = vcmask 64512   ;;  %v791_v2 = vmov 0.0   ;;  %vm792_vm1 = vmmov 0   ;;  %v793_v6 = vmov 0.0|0.0   ;;  %s1074_s0 = inlined_call_operand.vmem [shape: f32[2,128], index: 0, kind: input, shape index: {}]   ;;  %s1075_s1 = inlined_call_operand.vmem [shape: f32[2,8], index: 1, kind: input, shape index: {}]   ;;  %s1076_s2 = inlined_call_operand.vmem [shape: f32[8,128], index: 2, kind: input, shape index: {}]   ;;  %s1077_s3 = inlined_call_operand.vmem [shape: f32[1,128], index: 3, kind: input, shape index: {}]   ;;  %s1078_s4 = inlined_call_operand.vmem [shape: f32[128,16], index: 4, kind: input, shape index: {}]   ;;  %s1079_s5 = inlined_call_operand.vmem [shape: f32[1,16], index: 5, kind: input, shape index: {}]   ;;  %s1080_s6 = inlined_call_operand.vmem [shape: f32[128,128], index: 6, kind: input, shape index: {}]   ;;  %s1081_s7 = inlined_call_operand.vmem [shape: f32[16,128], index: 7, kind: input, shape index: {}]   ;;  %s1082_s8 = inlined_call_operand.vmem [shape: f32[1,128], index: 8, kind: input, shape index: {}]   ;;  %s1083_s9 = inlined_call_operand.vmem [shape: f32[128,4], index: 9, kind: input, shape index: {}]   ;;  %s1084_s10 = inlined_call_operand.vmem [shape: f32[1,4], index: 10, kind: input, shape index: {}]   ;;  %s1085_s11 = inlined_call_operand.hbm [shape: f32[2,4], index: 11, kind: output, shape index: {}]  }
   0x1   :  { %v40_v0 = vld [vmem:[%s1076_s2] sm:$0xff]  ;;  %567 = vmatprep.subr.mxu0 %v791_v2  ;;  %569 = vmatprep.mubr.msk.f32.mxu0 %vm792_vm1, %v791_v2  ;;  %v124_v4 = vld [vmem:[%s1078_s4 + $0x8] sm:$0xff]  ;;  %v125_v5 = vld [vmem:[%s1078_s4 + $0x10] sm:$0xff] }
   0x2   :  { %v39_v1 = vld [vmem:[%s1075_s1] sm:$0x3]  ;;  %568 = vmatpush3.msra.mxu0 %v40_v0  ;;  %684 = vmatprep.subr.bf16.mxu1 %v793_v6  ;;  %v126_v8 = vld [vmem:[%s1078_s4 + $0x18] sm:$0xff]  ;;  %v128_v11 = vld [vmem:[%s1078_s4 + $0x28] sm:$0xff] }
   0x3   :  { %v123_v3 = vld [vmem:[%s1078_s4] sm:$0xff]  ;;  %570 = vmatmul.mubr.msk.f32.vlgmr.msra.gmra.mrb[0].mxu0 %vm48_vm0, %v39_v1  ;;  %604 = vmatprep.mubr.msk.f32.mxu1 %vm792_vm1, %v791_v2  ;;  %v688_v9 = vpack.c.bf16 %v126_v8, %v125_v5 }
   0x4   :  { %v685_v7 = vpack.c.bf16 %v124_v4, %v123_v3  ;;  %708 = vmatprep.subr.bf16.mxu0 %v793_v6  ;;  %v127_v10 = vld [vmem:[%s1078_s4 + $0x20] sm:$0xff]  ;;  %611 = vmatprep.mubr.msk.f32.mxu0 %vm792_vm1, %v791_v2 }
   0x6   :  { %686 = vmatpush3.bf16.msra.mxu1 %v685_v7 }
   0x7   :  { %687 = vmatprep.subr.bf16.mxu1 %v793_v6 }
   0x8   :  { %16 = vsyncpa [#allocation3], 0  ;;  %v691_v12 = vpack.c.bf16 %v128_v11, %v127_v10  ;;  %v129_v13 = vld [vmem:[%s1078_s4 + $0x30] sm:$0xff]  ;;  %v130_v14 = vld [vmem:[%s1078_s4 + $0x38] sm:$0xff]  ;;  %vm236_vm2 = vcmask 130048   ;;  %vm488_vm4 = vcmask 25600  }
   0x9   :  { %v694_v15 = vpack.c.bf16 %v130_v14, %v129_v13  ;;  %v131_v16 = vld [vmem:[%s1078_s4 + $0x40] sm:$0xff]  ;;  %v132_v17 = vld [vmem:[%s1078_s4 + $0x48] sm:$0xff]  ;;  %v133_v19 = vld [vmem:[%s1078_s4 + $0x50] sm:$0xff] }
   0xa   :  { %689 = vmatpush3.bf16.msra.mxu1 %v688_v9  ;;  %v697_v18 = vpack.c.bf16 %v132_v17, %v131_v16  ;;  %v134_v20 = vld [vmem:[%s1078_s4 + $0x58] sm:$0xff]  ;;  %v135_v22 = vld [vmem:[%s1078_s4 + $0x60] sm:$0xff]  ;;  %v136_v23 = vld [vmem:[%s1078_s4 + $0x68] sm:$0xff] }
   0xb   :  { %690 = vmatprep.subr.bf16.mxu1 %v793_v6  ;;  %v700_v21 = vpack.c.bf16 %v134_v20, %v133_v19  ;;  %v703_v24 = vpack.c.bf16 %v136_v23, %v135_v22  ;;  %v137_v25 = vld [vmem:[%s1078_s4 + $0x70] sm:$0xff]  ;;  %v138_v26 = vld [vmem:[%s1078_s4 + $0x78] sm:$0xff]  ;;  %v504_v28 = vld [vmem:[%s1077_s3] ss:$0 sm:$0xff] }
   0xc   :  { %v706_v27 = vpack.c.bf16 %v138_v26, %v137_v25  ;;  %v234_v33 = vld [vmem:[%s1081_s7] sm:$0xff]  ;;  %v235_v34 = vld [vmem:[%s1081_s7 + $0x8] sm:$0xff]  ;;  %v220_v44 = vld [vmem:[%s1080_s6 + $0x10] sm:$0xff] }
   0xd   :  { %v709_v35 = vpack.c.bf16 %v235_v34, %v234_v33  ;;  %v506_v36 = vld [vmem:[%s1079_s5] ss:$0 sm:$0xff]  ;;  %v219_v38 = vld [vmem:[%s1080_s6 + $0x8] sm:$0xff]  ;;  %v221_v45 = vld [vmem:[%s1080_s6 + $0x18] sm:$0xff] }
   0xe   :  { %692 = vmatpush3.bf16.msra.mxu1 %v691_v12  ;;  %v218_v37 = vld [vmem:[%s1080_s6] sm:$0xff]  ;;  %v715_v46 = vpack.c.bf16 %v221_v45, %v220_v44  ;;  %v223_v48 = vld [vmem:[%s1080_s6 + $0x28] sm:$0xff]  ;;  %v224_v50 = vld [vmem:[%s1080_s6 + $0x30] sm:$0xff] }
   0xf   :  { %693 = vmatprep.subr.bf16.mxu1 %v793_v6  ;;  %710 = vmatpush3.bf16.msra.mxu0 %v709_v35  ;;  %v712_v42 = vpack.c.bf16 %v219_v38, %v218_v37  ;;  %v222_v47 = vld [vmem:[%s1080_s6 + $0x20] sm:$0xff]  ;;  %v225_v51 = vld [vmem:[%s1080_s6 + $0x38] sm:$0xff]  ;;  %v227_v54 = vld [vmem:[%s1080_s6 + $0x48] sm:$0xff] }
  0x10   :  { %711 = vmatprep.subr.bf16.mxu0 %v793_v6  ;;  %v718_v49 = vpack.c.bf16 %v223_v48, %v222_v47  ;;  %v721_v52 = vpack.c.bf16 %v225_v51, %v224_v50  ;;  %v226_v53 = vld [vmem:[%s1080_s6 + $0x40] sm:$0xff]  ;;  %v228_v56 = vld [vmem:[%s1080_s6 + $0x50] sm:$0xff]  ;;  %v229_v57 = vld [vmem:[%s1080_s6 + $0x58] sm:$0xff] }
  0x11   :  { %v724_v55 = vpack.c.bf16 %v227_v54, %v226_v53  ;;  %v727_v58 = vpack.c.bf16 %v229_v57, %v228_v56  ;;  %v230_v59 = vld [vmem:[%s1080_s6 + $0x60] sm:$0xff]  ;;  %v231_v60 = vld [vmem:[%s1080_s6 + $0x68] sm:$0xff]  ;;  %v232_v62 = vld [vmem:[%s1080_s6 + $0x70] sm:$0xff] }
  0x12   :  { %695 = vmatpush3.bf16.msra.mxu1 %v694_v15  ;;  %v730_v61 = vpack.c.bf16 %v231_v60, %v230_v59  ;;  %v233_v63 = vld [vmem:[%s1080_s6 + $0x78] sm:$0xff]  ;;  %v217_v1 = vld [vmem:[%s1074_s0] sm:$0x3]  ;;  %v395_v3 = vld [vmem:[%s1083_s9 + $0x8] sm:$0xff] }
  0x13   :  { %696 = vmatprep.subr.bf16.mxu1 %v793_v6  ;;  %v733_v0 = vpack.c.bf16 %v233_v63, %v232_v62  ;;  %v396_v4 = vld [vmem:[%s1083_s9 + $0x10] sm:$0xff]  ;;  %v397_v7 = vld [vmem:[%s1083_s9 + $0x18] sm:$0xff]  ;;  %v398_v9 = vld [vmem:[%s1083_s9 + $0x20] sm:$0xff] }
  0x14   :  { %v739_v8 = vpack.c.bf16 %v397_v7, %v396_v4  ;;  %v399_v10 = vld [vmem:[%s1083_s9 + $0x28] sm:$0xff]  ;;  %v400_v12 = vld [vmem:[%s1083_s9 + $0x30] sm:$0xff]  ;;  %v401_v13 = vld [vmem:[%s1083_s9 + $0x38] sm:$0xff] }
  0x15   :  { %v742_v11 = vpack.c.bf16 %v399_v10, %v398_v9  ;;  %v745_v14 = vpack.c.bf16 %v401_v13, %v400_v12  ;;  %v402_v15 = vld [vmem:[%s1083_s9 + $0x40] sm:$0xff]  ;;  %v403_v16 = vld [vmem:[%s1083_s9 + $0x48] sm:$0xff]  ;;  %v405_v19 = vld [vmem:[%s1083_s9 + $0x58] sm:$0xff] }
  0x16   :  { %698 = vmatpush3.bf16.msra.mxu1 %v697_v18  ;;  %v748_v17 = vpack.c.bf16 %v403_v16, %v402_v15  ;;  %v404_v18 = vld [vmem:[%s1083_s9 + $0x50] sm:$0xff]  ;;  %v406_v20 = vld [vmem:[%s1083_s9 + $0x60] sm:$0xff]  ;;  %v407_v22 = vld [vmem:[%s1083_s9 + $0x68] sm:$0xff] }
  0x17   :  { %699 = vmatprep.subr.bf16.mxu1 %v793_v6  ;;  %v754_v23 = vpack.c.bf16 %v407_v22, %v406_v20  ;;  %v409_v25 = vld [vmem:[%s1083_s9 + $0x78] sm:$0xff] }
  0x1a   :  { %701 = vmatpush3.bf16.msra.mxu1 %v700_v21  ;;  %v751_v21 = vpack.c.bf16 %v405_v19, %v404_v18 }
  0x1b   :  { %702 = vmatprep.subr.bf16.mxu1 %v793_v6 }
  0x1e   :  { %704 = vmatpush3.bf16.msra.mxu1 %v703_v24  ;;  %v408_v24 = vld [vmem:[%s1083_s9 + $0x70] sm:$0xff] }
  0x1f   :  { %705 = vmatprep.subr.bf16.mxu1 %v793_v6  ;;  %v757_v26 = vpack.c.bf16 %v409_v25, %v408_v24 }
  0x22   :  { %707 = vmatpush3.bf16.msra.mxu1 %v706_v27 }
  0x23   :  { %735 = vmatprep.subr.bf16.mxu1 %v793_v6 }
  0xd6   :  { %v118_v29 = vpop.f32.mrb[0].mxu0 }
  0xd7   :  { %v119_v30 = vadd.f32 %v504_v28, %v118_v29  ;;  %v571_v31 = vpop.f32.mrb[1].mxu0 }
  0xd9   :  { %v122_v32 = vmax.f32 %v119_v30, 0.0  ;;  %v508_v30 = vld [vmem:[%s1082_s8] ss:$0 sm:$0xff]  ;;  %s794_s8 = smov [#allocation2]  }
  0xda   :  { %s496_s0 = sshll.u32 %s794_s8, 4  ;;  %s497_s0 = int_to_ptr.vmem [resolvable:$true] %s496_s0 }
  0xdb   :  { %605 = vmatmul.mubr.f32.vlgmr.msra.gmra.mrb[0].mxu1 %v122_v32  ;;  %s767_s29 = scalar_lea.vmem %s497_s0, 32  ;;  %p772_p1 = scmp.lt.s32.totalorder %s497_s0, %s497_s0 }
  0xdc   :  { %681 = vmatprep.mubr.msk.f32.mxu1 %vm792_vm1, %v791_v2  ;;  %p768_p0 = scmp.ne.s32.totalorder %s497_s0, %s767_s29  ;;  %p773_p2 = scmp.lt.s32.totalorder %s767_s29, %s767_s29 }
  0xde   :  { %p774_p3 = por %p773_p2, %p772_p1 }
  0xe0   :  { %p775_p4 = pnand %p774_p3, %p768_p0 }
 0x1ae   :  { %v212_v39 = vpop.f32.mrb[0].mxu1 }
 0x1af   :  { %v213_v40 = vadd.f32 %v506_v36, %v212_v39  ;;  %v606_v41 = vpop.f32.mrb[1].mxu1 }
 0x1b1   :  { %v216_v43 = vmax.f32 %v213_v40, 0.0 }
 0x1b3   :  { %612 = vmatmul.mubr.msk.f32.vlgmr.msra.gmra.mrb[2].mxu0 %vm236_vm2, %v216_v43 }
 0x1b4   :  { %713 = vmatpush3.bf16.msra.mxu0 %v712_v42  ;;  %646 = vmatprep.mubr.msk.f32.mxu0 %vm792_vm1, %v791_v2  ;;  %v394_v2 = vld [vmem:[%s1083_s9] sm:$0xff] }
 0x1b5   :  { %714 = vmatprep.subr.bf16.mxu0 %v793_v6  ;;  %v736_v5 = vpack.c.bf16 %v395_v3, %v394_v2 }
 0x1b7   :  { %737 = vmatpush3.bf16.msra.mxu1 %v736_v5 }
 0x1b8   :  { %716 = vmatpush3.bf16.msra.mxu0 %v715_v46  ;;  %738 = vmatprep.subr.bf16.mxu1 %v793_v6 }
 0x1b9   :  { %717 = vmatprep.subr.bf16.mxu0 %v793_v6 }
 0x1bb   :  { %740 = vmatpush3.bf16.msra.mxu1 %v739_v8 }
 0x1bc   :  { %719 = vmatpush3.bf16.msra.mxu0 %v718_v49  ;;  %741 = vmatprep.subr.bf16.mxu1 %v793_v6 }
 0x1bd   :  { %720 = vmatprep.subr.bf16.mxu0 %v793_v6 }
 0x1bf   :  { %743 = vmatpush3.bf16.msra.mxu1 %v742_v11 }
 0x1c0   :  { %722 = vmatpush3.bf16.msra.mxu0 %v721_v52  ;;  %744 = vmatprep.subr.bf16.mxu1 %v793_v6 }
 0x1c1   :  { %723 = vmatprep.subr.bf16.mxu0 %v793_v6 }
 0x1c3   :  { %746 = vmatpush3.bf16.msra.mxu1 %v745_v14 }
 0x1c4   :  { %725 = vmatpush3.bf16.msra.mxu0 %v724_v55  ;;  %747 = vmatprep.subr.bf16.mxu1 %v793_v6 }
 0x1c5   :  { %726 = vmatprep.subr.bf16.mxu0 %v793_v6 }
 0x1c7   :  { %749 = vmatpush3.bf16.msra.mxu1 %v748_v17 }
 0x1c8   :  { %728 = vmatpush3.bf16.msra.mxu0 %v727_v58  ;;  %750 = vmatprep.subr.bf16.mxu1 %v793_v6 }
 0x1c9   :  { %729 = vmatprep.subr.bf16.mxu0 %v793_v6 }
 0x1cb   :  { %752 = vmatpush3.bf16.msra.mxu1 %v751_v21 }
 0x1cc   :  { %731 = vmatpush3.bf16.msra.mxu0 %v730_v61  ;;  %753 = vmatprep.subr.bf16.mxu1 %v793_v6 }
 0x1cd   :  { %732 = vmatprep.subr.bf16.mxu0 %v793_v6 }
 0x1cf   :  { %755 = vmatpush3.bf16.msra.mxu1 %v754_v23 }
 0x1d0   :  { %734 = vmatpush3.bf16.msra.mxu0 %v733_v0  ;;  %756 = vmatprep.subr.bf16.mxu1 %v793_v6  ;;  %v510_v6 = vld [vmem:[%s1084_s10] ss:$0 sm:$0xff] }
 0x1d3   :  { %647 = vmatmul.mubr.f32.vlgmr.msra.gmra.mrb[4].mxu0 %v217_v1  ;;  %758 = vmatpush3.bf16.msra.mxu1 %v757_v26 }
 0x286   :  { %v306_v27 = vpop.f32.mrb[2].mxu0 }
 0x287   :  { %v613_v28 = vpop.f32.mrb[3].mxu0 }
 0x2a6   :  { %v376_v29 = vpop.f32.mrb[4].mxu0 }
 0x2a7   :  { %v377_v31 = vadd.f32 %v376_v29, %v306_v27  ;;  %v648_v32 = vpop.f32.mrb[5].mxu0 }
 0x2a9   :  { %v387_v33 = vadd.f32 %v508_v30, %v377_v31 }
 0x2ab   :  { %v389_v34 = vmin.f32 %v387_v33, 0.0  ;;  %vm388_vm3 = vcmp.gt.f32.partialorder %v387_v33, 0.0 }
 0x2ad   :  { %v390_v35 = vmul.f32 1.442695, %v389_v34 }
 0x2af   :  { %763 = vpow2.f32 %v390_v35 }
 0x2b9   :  { %v764_v36 = vpop.eup %763 }
 0x2ba   :  { %v509_v37 = vadd.f32 -1.0, %v764_v36 }
 0x2bc   :  { %v393_v38 = vsel %vm388_vm3, %v387_v33, %v509_v37 }
 0x2bd   :  { %682 = vmatmul.mubr.f32.vlgmr.msra.gmra.mrb[2].mxu1 %v393_v38 }
 0x390   :  { %v483_v39 = vpop.f32.mrb[2].mxu1 }
 0x391   :  { %v484_v40 = vadd.f32 %v510_v6, %v483_v39  ;;  %v683_v41 = vpop.f32.mrb[3].mxu1 }
 0x393   :  { %765 = vtanh.f32 %v484_v40 }
 0x39d   :  { %v766_v42 = vpop.eup %765 }
 0x39e   :  { %489 = vst.msk [vmem:[#allocation2] sm:$0x3] %vm488_vm4, %v766_v42 }
 0x39f   :  { %778 = shalt.err (!%p775_p4)
}
 0x3a0   :  { %s779_s10 = scalar_lea.hbm %s1085_s11, 32 }
 0x3a1   :  { %p780_p5 = scmp.ne.s32.totalorder %s1085_s11, %s779_s10  ;;  %p783_p6 = scmp.lt.u32.totalorder %s779_s10, %s1085_s11 }
 0x3a3   :  { %p785_p7 = pnand %p783_p6, %p780_p5 }
 0x3a5   :  { %788 = shalt.err (!%p785_p7)
}
 0x3a6   :  { %499 = dma.vmem_to_hbm [thread:$0]  %s497_s0, 32, %s1085_s11, [#allocation3]  }
 0x3a7   :  { %789 = dma.done.wait [#allocation3], 32  }
 0x3a8   :  { %790 = vsyncadd [#allocation3], 4294967264 }
 0x3a9   :  { %503 = vsyncpa [#allocation3], 1 }

</bundles_post_ra>
